<compile_context>
chip_gen: v7x
topology: tpu7x:2x2x1
jax: 0.10.0
libtpu: 0.0.40
codegen_flags: <defaults>
</compile_context>

<pallas_src>
import functools

import jax
import jax.numpy as jnp
from jax import lax
from jax.experimental import pallas as pl
from jax.experimental.pallas import tpu as pltpu

BN_EPS = 1e-5
LANE = 128      # lane-dense feature width (pad feature dims to this)
SUBLANE = 8     # pad tiny leading dims (param rows, pooled-graph rows) to this

# Row indices inside the packed (8, LANE) per-layer parameter block.
ROW_B1, ROW_G1, ROW_BE1, ROW_B2, ROW_GBN, ROW_BBN = 0, 1, 2, 3, 4, 5


def _batchnorm_relu(z, gamma, beta):
    """Training-mode BatchNorm1d (batch stats, biased variance) + ReLU.

    Single-pass stats: var = E[z^2] - mu^2 (halves the axis-0 XLU reductions).
    """
    inv_n = 1.0 / z.shape[0]
    s1 = jnp.sum(z, axis=0, keepdims=True)
    s2 = jnp.sum(z * z, axis=0, keepdims=True)
    mu = s1 * inv_n
    var = jnp.maximum(s2 * inv_n - mu * mu, 0.0)
    z = (z - mu) * lax.rsqrt(var + BN_EPS) * gamma + beta
    return jnp.maximum(z, 0.0)


def fused_graph_cnn_kernel(adj_ref, x_ref, gp_ref, w_ref, p_ref,
                           h_out_ref, pooled_out_ref, *, num_gin_layers):
    """Whole GraphCNN forward in one kernel invocation (single grid point).

    adj_ref:    (N, N)            dense adjacency (with self-loops)
    x_ref:      (N, LANE)         node features, zero-padded to 128 lanes
    gp_ref:     (B_pad, N)        dense graph_pool, rows padded to 8
    w_ref:      (2L, LANE, LANE)  [W1_l0, W2_l0, W1_l1, W2_l1, ...], zero-padded
    p_ref:      (L, 8, LANE)      packed per-layer vectors (b1,g1,be1,b2,gbn,bbn)
    h_out_ref:  (N, LANE)         final node embeddings (padded)
    pooled_out_ref: (B_pad, LANE) graph readout (padded)
    """
    adj = adj_ref[...]
    h = x_ref[...]

    # Layers are unrolled in Python; h never leaves VMEM between them.
    for layer in range(num_gin_layers):
        # Neighbor sum pooling: pooled = Adj @ h   (MXU)
        pooled = jnp.dot(adj, h, preferred_element_type=jnp.float32)

        pvec = p_ref[layer]           # (8, LANE) — one vreg tile of params
        w1 = w_ref[2 * layer]         # (LANE, LANE)
        w2 = w_ref[2 * layer + 1]     # (LANE, LANE)

        # MLP hidden layer: Linear -> BatchNorm1d -> ReLU
        z = jnp.dot(pooled, w1, preferred_element_type=jnp.float32)
        z = z + pvec[ROW_B1:ROW_B1 + 1]
        z = _batchnorm_relu(z, pvec[ROW_G1:ROW_G1 + 1], pvec[ROW_BE1:ROW_BE1 + 1])

        # MLP output layer (linear, no activation inside the MLP)
        z = jnp.dot(z, w2, preferred_element_type=jnp.float32)
        z = z + pvec[ROW_B2:ROW_B2 + 1]

        # GraphCNN outer BatchNorm1d + ReLU
        h = _batchnorm_relu(z, pvec[ROW_GBN:ROW_GBN + 1], pvec[ROW_BBN:ROW_BBN + 1])

    # Lane-dense stores (full 128-lane rows, no masked partial stores).
    h_out_ref[...] = h
    # Fused graph readout: pooled_h = graph_pool @ h (stand-in for torch.sparse.mm).
    pooled_out_ref[...] = jnp.dot(gp_ref[...], h, preferred_element_type=jnp.float32)


def _pad_up(n, m):
    return ((n + m - 1) // m) * m


def _pack_layer_params(layer_params):
    """Zero-pad weights to (LANE, LANE) and pack the 6 vectors into (8, LANE)."""
    w_list, p_list = [], []
    for params in layer_params:
        din, dh = params["w1"].shape
        w1 = jnp.zeros((LANE, LANE), jnp.float32).at[:din, :dh].set(params["w1"])
        w2 = jnp.zeros((LANE, LANE), jnp.float32).at[:dh, :dh].set(params["w2"])
        w_list += [w1, w2]

        p = jnp.zeros((SUBLANE, LANE), jnp.float32)
        p = p.at[ROW_B1, :dh].set(params["b1"].reshape(-1))
        p = p.at[ROW_G1, :dh].set(params["g1"].reshape(-1))
        p = p.at[ROW_BE1, :dh].set(params["be1"].reshape(-1))
        p = p.at[ROW_B2, :dh].set(params["b2"].reshape(-1))
        p = p.at[ROW_GBN, :dh].set(params["gbn"].reshape(-1))
        p = p.at[ROW_BBN, :dh].set(params["bbn"].reshape(-1))
        p_list.append(p)
    # Padded gamma/beta/bias rows are 0 => padded feature lanes stay exactly 0
    # through every Linear/BN/ReLU, so slicing the output recovers exact results.
    return jnp.stack(w_list), jnp.stack(p_list)   # (2L,LANE,LANE), (L,8,LANE)


def graph_cnn_forward(x, graph_pool, adj, layer_params):
    """Full GraphCNN.forward (sum pooling, learn_eps=False) as one fused kernel."""
    n, in_dim = x.shape
    b = graph_pool.shape[0]
    num_gin = len(layer_params)
    hidden = layer_params[0]["w2"].shape[1]
    b_pad = _pad_up(b, SUBLANE)

    assert in_dim <= LANE and hidden <= LANE, "feature dims must fit in one lane tile"

    # Lane-dense / sublane-dense padded operands.
    x_p = jnp.zeros((n, LANE), jnp.float32).at[:, :in_dim].set(x)
    gp_p = jnp.zeros((b_pad, n), jnp.float32).at[:b, :].set(graph_pool)
    w_packed, p_packed = _pack_layer_params(layer_params)

    def vmem():
        return pl.BlockSpec(memory_space=pltpu.MemorySpace.VMEM)

    h_pad, pooled_pad = pl.pallas_call(
        functools.partial(fused_graph_cnn_kernel, num_gin_layers=num_gin),
        out_shape=(
            jax.ShapeDtypeStruct((n, LANE), jnp.float32),
            jax.ShapeDtypeStruct((b_pad, LANE), jnp.float32),
        ),
        in_specs=[vmem(), vmem(), vmem(), vmem(), vmem()],
        out_specs=(vmem(), vmem()),
    )(adj, x_p, gp_p, w_packed, p_packed)

    pooled_h = pooled_pad[:b, :hidden]
    h_nodes = h_pad[:, :hidden]
    return pooled_h, h_nodes


# ----------------------------------------------------------------------------
# Pure-JAX reference (mirrors the PyTorch module, training-mode BatchNorm).
# ----------------------------------------------------------------------------
def _reference_forward(x, graph_pool, adj, layer_params):
    def bn_relu(z, g, be):
        mu = jnp.mean(z, axis=0, keepdims=True)
        var = jnp.mean((z - mu) ** 2, axis=0, keepdims=True)
        z = (z - mu) * lax.rsqrt(var + BN_EPS) * g + be
        return jnp.maximum(z, 0.0)

    h = x
    for p in layer_params:
        pooled = adj @ h
        z = pooled @ p["w1"] + p["b1"]
        z = bn_relu(z, p["g1"], p["be1"])
        z = z @ p["w2"] + p["b2"]
        h = bn_relu(z, p["gbn"], p["bbn"])
    return graph_pool @ h, h


def init_layer_params(key, in_dim, hidden_dim):
    """Deterministic synthetic params (PyTorch Linear stores (out,in); pre-transposed)."""
    k1, k2, k3, k4 = jax.random.split(key, 4)
    s1 = 1.0 / jnp.sqrt(in_dim)
    s2 = 1.0 / jnp.sqrt(hidden_dim)
    return {
        # MLP hidden Linear
        "w1": jax.random.uniform(k1, (in_dim, hidden_dim), jnp.float32, -s1, s1),
        "b1": jax.random.uniform(k2, (1, hidden_dim), jnp.float32, -s1, s1),
        # MLP-internal BatchNorm1d affine
        "g1": jnp.ones((1, hidden_dim), jnp.float32),
        "be1": jnp.zeros((1, hidden_dim), jnp.float32),
        # MLP output Linear
        "w2": jax.random.uniform(k3, (hidden_dim, hidden_dim), jnp.float32, -s2, s2),
        "b2": jax.random.uniform(k4, (1, hidden_dim), jnp.float32, -s2, s2),
        # GraphCNN outer BatchNorm1d affine
        "gbn": jnp.ones((1, hidden_dim), jnp.float32),
        "bbn": jnp.zeros((1, hidden_dim), jnp.float32),
    }


if __name__ == "__main__":
    # Small shapes consistent with the module:
    #   N = 64 graph nodes (batch of graphs flattened node-wise),
    #   input_dim = 16, hidden_dim = 32, num_layers = 3, num_mlp_layers = 2,
    #   B = 2 graphs for the graph_pool readout.
    num_layers = 3
    N, input_dim, hidden_dim, B = 64, 16, 32, 2

    key = jax.random.PRNGKey(0)
    kx, kadj, kp0, kp1 = jax.random.split(key, 4)

    # Node features
    x = jax.random.normal(kx, (N, input_dim), jnp.float32)

    # Dense adjacency with self-loops (binary, as in the JSSP graphs)
    adj_rand = (jax.random.uniform(kadj, (N, N)) < 0.1).astype(jnp.float32)
    adj = jnp.maximum(adj_rand, jnp.eye(N, dtype=jnp.float32))

    # graph_pool: average-pooling matrix over two graphs of 32 nodes each
    # (dense stand-in for the sparse graph_pool used by torch.sparse.mm)
    seg = jnp.repeat(jnp.arange(B), N // B)                               # (N,)
    graph_pool = (jax.nn.one_hot(seg, B, dtype=jnp.float32).T) * (B / N)  # (B, N)

    # Per-layer params: layer 0 maps input_dim->hidden, layer 1 hidden->hidden
    layer_params = [
        init_layer_params(kp0, input_dim, hidden_dim),
        init_layer_params(kp1, hidden_dim, hidden_dim),
    ]
    assert len(layer_params) == num_layers - 1

    pooled_h, h_nodes = graph_cnn_forward(x, graph_pool, adj, layer_params)
    jax.block_until_ready((pooled_h, h_nodes))

    assert pooled_h.shape == (B, hidden_dim)
    assert h_nodes.shape == (N, hidden_dim)
    assert bool(jnp.all(jnp.isfinite(pooled_h))) and bool(jnp.all(jnp.isfinite(h_nodes)))

    # Correctness vs. pure-JAX reference of the PyTorch forward.
    ref_pooled, ref_h = _reference_forward(x, graph_pool, adj, layer_params)
    assert jnp.allclose(pooled_h, ref_pooled, atol=1e-3, rtol=1e-3)
    assert jnp.allclose(h_nodes, ref_h, atol=1e-3, rtol=1e-3)

    print("KERNEL_OK")
</pallas_src>

<mosaic_0001>
module attributes {stable_mosaic.version = 11 : i64} {
  func.func @fused_graph_cnn_kernel(%arg0: memref<64x64xf32, #tpu.memory_space<vmem>>, %arg1: memref<64x128xf32, #tpu.memory_space<vmem>>, %arg2: memref<8x64xf32, #tpu.memory_space<vmem>>, %arg3: memref<4x128x128xf32, #tpu.memory_space<vmem>>, %arg4: memref<2x8x128xf32, #tpu.memory_space<vmem>>, %arg5: memref<64x128xf32, #tpu.memory_space<vmem>>, %arg6: memref<8x128xf32, #tpu.memory_space<vmem>>) attributes {dimension_semantics = [], scalar_prefetch = 0 : i64, scratch_operands = 0 : i64, tpu.core_type = #tpu.core_type<tc>} {
    %c0 = arith.constant 0 : index
    %c0_0 = arith.constant 0 : index
    %0 = vector.load %arg0[%c0, %c0_0] : memref<64x64xf32, #tpu.memory_space<vmem>>, vector<64x64xf32>
    %c0_1 = arith.constant 0 : index
    %c0_2 = arith.constant 0 : index
    %1 = vector.load %arg1[%c0_1, %c0_2] : memref<64x128xf32, #tpu.memory_space<vmem>>, vector<64x128xf32>
    %cst = arith.constant dense<0.000000e+00> : vector<64x128xf32>
    %2 = tpu.matmul %0, %1, %cst {dimension_numbers = #tpu.dot_dimension_numbers<[1], [0], [0], [1], [0, 0, 1, 1], [], []>} : vector<64x64xf32>, vector<64x128xf32>, vector<64x128xf32> -> vector<64x128xf32>
    %c0_3 = arith.constant 0 : index
    %c0_4 = arith.constant 0 : index
    %c0_5 = arith.constant 0 : index
    %3 = vector.load %arg4[%c0_3, %c0_4, %c0_5] : memref<2x8x128xf32, #tpu.memory_space<vmem>>, vector<1x8x128xf32>
    %4 = vector.shape_cast %3 : vector<1x8x128xf32> to vector<8x128xf32>
    %c0_6 = arith.constant 0 : index
    %c0_7 = arith.constant 0 : index
    %c0_8 = arith.constant 0 : index
    %5 = vector.load %arg3[%c0_6, %c0_7, %c0_8] : memref<4x128x128xf32, #tpu.memory_space<vmem>>, vector<1x128x128xf32>
    %6 = vector.shape_cast %5 : vector<1x128x128xf32> to vector<128x128xf32>
    %c1 = arith.constant 1 : index
    %c0_9 = arith.constant 0 : index
    %c0_10 = arith.constant 0 : index
    %7 = vector.load %arg3[%c1, %c0_9, %c0_10] : memref<4x128x128xf32, #tpu.memory_space<vmem>>, vector<1x128x128xf32>
    %8 = vector.shape_cast %7 : vector<1x128x128xf32> to vector<128x128xf32>
    %cst_11 = arith.constant dense<0.000000e+00> : vector<64x128xf32>
    %9 = tpu.matmul %2, %6, %cst_11 {dimension_numbers = #tpu.dot_dimension_numbers<[1], [0], [0], [1], [0, 0, 1, 1], [], []>} : vector<64x128xf32>, vector<128x128xf32>, vector<64x128xf32> -> vector<64x128xf32>
    %10 = vector.extract_strided_slice %4 {offsets = [0, 0], sizes = [1, 128], strides = [1, 1]} : vector<8x128xf32> to vector<1x128xf32>
    %11 = vector.broadcast %10 : vector<1x128xf32> to vector<64x128xf32>
    %12 = arith.addf %9, %11 : vector<64x128xf32>
    %13 = vector.extract_strided_slice %4 {offsets = [1, 0], sizes = [1, 128], strides = [1, 1]} : vector<8x128xf32> to vector<1x128xf32>
    %14 = vector.extract_strided_slice %4 {offsets = [2, 0], sizes = [1, 128], strides = [1, 1]} : vector<8x128xf32> to vector<1x128xf32>
    %cst_12 = arith.constant dense<0.000000e+00> : vector<128xf32>
    %15 = vector.multi_reduction <add>, %12, %cst_12 [0] : vector<64x128xf32> to vector<128xf32>
    %16 = vector.shape_cast %15 : vector<128xf32> to vector<1x128xf32>
    %17 = arith.mulf %12, %12 : vector<64x128xf32>
    %cst_13 = arith.constant dense<0.000000e+00> : vector<128xf32>
    %18 = vector.multi_reduction <add>, %17, %cst_13 [0] : vector<64x128xf32> to vector<128xf32>
    %19 = vector.shape_cast %18 : vector<128xf32> to vector<1x128xf32>
    %cst_14 = arith.constant 1.562500e-02 : f32
    %20 = vector.broadcast %cst_14 : f32 to vector<1x128xf32>
    %21 = arith.mulf %16, %20 : vector<1x128xf32>
    %cst_15 = arith.constant 1.562500e-02 : f32
    %22 = vector.broadcast %cst_15 : f32 to vector<1x128xf32>
    %23 = arith.mulf %19, %22 : vector<1x128xf32>
    %24 = arith.mulf %21, %21 : vector<1x128xf32>
    %25 = arith.subf %23, %24 : vector<1x128xf32>
    %cst_16 = arith.constant 0.000000e+00 : f32
    %26 = vector.broadcast %cst_16 : f32 to vector<1x128xf32>
    %27 = arith.maximumf %25, %26 : vector<1x128xf32>
    %28 = vector.broadcast %21 : vector<1x128xf32> to vector<64x128xf32>
    %29 = arith.subf %12, %28 : vector<64x128xf32>
    %cst_17 = arith.constant 9.99999974E-6 : f32
    %30 = vector.broadcast %cst_17 : f32 to vector<1x128xf32>
    %31 = arith.addf %27, %30 : vector<1x128xf32>
    %32 = math.rsqrt %31 : vector<1x128xf32>
    %33 = vector.broadcast %32 : vector<1x128xf32> to vector<64x128xf32>
    %34 = arith.mulf %29, %33 : vector<64x128xf32>
    %35 = vector.broadcast %13 : vector<1x128xf32> to vector<64x128xf32>
    %36 = arith.mulf %34, %35 : vector<64x128xf32>
    %37 = vector.broadcast %14 : vector<1x128xf32> to vector<64x128xf32>
    %38 = arith.addf %36, %37 : vector<64x128xf32>
    %cst_18 = arith.constant 0.000000e+00 : f32
    %39 = vector.broadcast %cst_18 : f32 to vector<64x128xf32>
    %40 = arith.maximumf %38, %39 : vector<64x128xf32>
    %cst_19 = arith.constant dense<0.000000e+00> : vector<64x128xf32>
    %41 = tpu.matmul %40, %8, %cst_19 {dimension_numbers = #tpu.dot_dimension_numbers<[1], [0], [0], [1], [0, 0, 1, 1], [], []>} : vector<64x128xf32>, vector<128x128xf32>, vector<64x128xf32> -> vector<64x128xf32>
    %42 = vector.extract_strided_slice %4 {offsets = [3, 0], sizes = [1, 128], strides = [1, 1]} : vector<8x128xf32> to vector<1x128xf32>
    %43 = vector.broadcast %42 : vector<1x128xf32> to vector<64x128xf32>
    %44 = arith.addf %41, %43 : vector<64x128xf32>
    %45 = vector.extract_strided_slice %4 {offsets = [4, 0], sizes = [1, 128], strides = [1, 1]} : vector<8x128xf32> to vector<1x128xf32>
    %46 = vector.extract_strided_slice %4 {offsets = [5, 0], sizes = [1, 128], strides = [1, 1]} : vector<8x128xf32> to vector<1x128xf32>
    %cst_20 = arith.constant dense<0.000000e+00> : vector<128xf32>
    %47 = vector.multi_reduction <add>, %44, %cst_20 [0] : vector<64x128xf32> to vector<128xf32>
    %48 = vector.shape_cast %47 : vector<128xf32> to vector<1x128xf32>
    %49 = arith.mulf %44, %44 : vector<64x128xf32>
    %cst_21 = arith.constant dense<0.000000e+00> : vector<128xf32>
    %50 = vector.multi_reduction <add>, %49, %cst_21 [0] : vector<64x128xf32> to vector<128xf32>
    %51 = vector.shape_cast %50 : vector<128xf32> to vector<1x128xf32>
    %cst_22 = arith.constant 1.562500e-02 : f32
    %52 = vector.broadcast %cst_22 : f32 to vector<1x128xf32>
    %53 = arith.mulf %48, %52 : vector<1x128xf32>
    %cst_23 = arith.constant 1.562500e-02 : f32
    %54 = vector.broadcast %cst_23 : f32 to vector<1x128xf32>
    %55 = arith.mulf %51, %54 : vector<1x128xf32>
    %56 = arith.mulf %53, %53 : vector<1x128xf32>
    %57 = arith.subf %55, %56 : vector<1x128xf32>
    %cst_24 = arith.constant 0.000000e+00 : f32
    %58 = vector.broadcast %cst_24 : f32 to vector<1x128xf32>
    %59 = arith.maximumf %57, %58 : vector<1x128xf32>
    %60 = vector.broadcast %53 : vector<1x128xf32> to vector<64x128xf32>
    %61 = arith.subf %44, %60 : vector<64x128xf32>
    %cst_25 = arith.constant 9.99999974E-6 : f32
    %62 = vector.broadcast %cst_25 : f32 to vector<1x128xf32>
    %63 = arith.addf %59, %62 : vector<1x128xf32>
    %64 = math.rsqrt %63 : vector<1x128xf32>
    %65 = vector.broadcast %64 : vector<1x128xf32> to vector<64x128xf32>
    %66 = arith.mulf %61, %65 : vector<64x128xf32>
    %67 = vector.broadcast %45 : vector<1x128xf32> to vector<64x128xf32>
    %68 = arith.mulf %66, %67 : vector<64x128xf32>
    %69 = vector.broadcast %46 : vector<1x128xf32> to vector<64x128xf32>
    %70 = arith.addf %68, %69 : vector<64x128xf32>
    %cst_26 = arith.constant 0.000000e+00 : f32
    %71 = vector.broadcast %cst_26 : f32 to vector<64x128xf32>
    %72 = arith.maximumf %70, %71 : vector<64x128xf32>
    %cst_27 = arith.constant dense<0.000000e+00> : vector<64x128xf32>
    %73 = tpu.matmul %0, %72, %cst_27 {dimension_numbers = #tpu.dot_dimension_numbers<[1], [0], [0], [1], [0, 0, 1, 1], [], []>} : vector<64x64xf32>, vector<64x128xf32>, vector<64x128xf32> -> vector<64x128xf32>
    %c1_28 = arith.constant 1 : index
    %c0_29 = arith.constant 0 : index
    %c0_30 = arith.constant 0 : index
    %74 = vector.load %arg4[%c1_28, %c0_29, %c0_30] : memref<2x8x128xf32, #tpu.memory_space<vmem>>, vector<1x8x128xf32>
    %75 = vector.shape_cast %74 : vector<1x8x128xf32> to vector<8x128xf32>
    %c2 = arith.constant 2 : index
    %c0_31 = arith.constant 0 : index
    %c0_32 = arith.constant 0 : index
    %76 = vector.load %arg3[%c2, %c0_31, %c0_32] : memref<4x128x128xf32, #tpu.memory_space<vmem>>, vector<1x128x128xf32>
    %77 = vector.shape_cast %76 : vector<1x128x128xf32> to vector<128x128xf32>
    %c3 = arith.constant 3 : index
    %c0_33 = arith.constant 0 : index
    %c0_34 = arith.constant 0 : index
    %78 = vector.load %arg3[%c3, %c0_33, %c0_34] : memref<4x128x128xf32, #tpu.memory_space<vmem>>, vector<1x128x128xf32>
    %79 = vector.shape_cast %78 : vector<1x128x128xf32> to vector<128x128xf32>
    %cst_35 = arith.constant dense<0.000000e+00> : vector<64x128xf32>
    %80 = tpu.matmul %73, %77, %cst_35 {dimension_numbers = #tpu.dot_dimension_numbers<[1], [0], [0], [1], [0, 0, 1, 1], [], []>} : vector<64x128xf32>, vector<128x128xf32>, vector<64x128xf32> -> vector<64x128xf32>
    %81 = vector.extract_strided_slice %75 {offsets = [0, 0], sizes = [1, 128], strides = [1, 1]} : vector<8x128xf32> to vector<1x128xf32>
    %82 = vector.broadcast %81 : vector<1x128xf32> to vector<64x128xf32>
    %83 = arith.addf %80, %82 : vector<64x128xf32>
    %84 = vector.extract_strided_slice %75 {offsets = [1, 0], sizes = [1, 128], strides = [1, 1]} : vector<8x128xf32> to vector<1x128xf32>
    %85 = vector.extract_strided_slice %75 {offsets = [2, 0], sizes = [1, 128], strides = [1, 1]} : vector<8x128xf32> to vector<1x128xf32>
    %cst_36 = arith.constant dense<0.000000e+00> : vector<128xf32>
    %86 = vector.multi_reduction <add>, %83, %cst_36 [0] : vector<64x128xf32> to vector<128xf32>
    %87 = vector.shape_cast %86 : vector<128xf32> to vector<1x128xf32>
    %88 = arith.mulf %83, %83 : vector<64x128xf32>
    %cst_37 = arith.constant dense<0.000000e+00> : vector<128xf32>
    %89 = vector.multi_reduction <add>, %88, %cst_37 [0] : vector<64x128xf32> to vector<128xf32>
    %90 = vector.shape_cast %89 : vector<128xf32> to vector<1x128xf32>
    %cst_38 = arith.constant 1.562500e-02 : f32
    %91 = vector.broadcast %cst_38 : f32 to vector<1x128xf32>
    %92 = arith.mulf %87, %91 : vector<1x128xf32>
    %cst_39 = arith.constant 1.562500e-02 : f32
    %93 = vector.broadcast %cst_39 : f32 to vector<1x128xf32>
    %94 = arith.mulf %90, %93 : vector<1x128xf32>
    %95 = arith.mulf %92, %92 : vector<1x128xf32>
    %96 = arith.subf %94, %95 : vector<1x128xf32>
    %cst_40 = arith.constant 0.000000e+00 : f32
    %97 = vector.broadcast %cst_40 : f32 to vector<1x128xf32>
    %98 = arith.maximumf %96, %97 : vector<1x128xf32>
    %99 = vector.broadcast %92 : vector<1x128xf32> to vector<64x128xf32>
    %100 = arith.subf %83, %99 : vector<64x128xf32>
    %cst_41 = arith.constant 9.99999974E-6 : f32
    %101 = vector.broadcast %cst_41 : f32 to vector<1x128xf32>
    %102 = arith.addf %98, %101 : vector<1x128xf32>
    %103 = math.rsqrt %102 : vector<1x128xf32>
    %104 = vector.broadcast %103 : vector<1x128xf32> to vector<64x128xf32>
    %105 = arith.mulf %100, %104 : vector<64x128xf32>
    %106 = vector.broadcast %84 : vector<1x128xf32> to vector<64x128xf32>
    %107 = arith.mulf %105, %106 : vector<64x128xf32>
    %108 = vector.broadcast %85 : vector<1x128xf32> to vector<64x128xf32>
    %109 = arith.addf %107, %108 : vector<64x128xf32>
    %cst_42 = arith.constant 0.000000e+00 : f32
    %110 = vector.broadcast %cst_42 : f32 to vector<64x128xf32>
    %111 = arith.maximumf %109, %110 : vector<64x128xf32>
    %cst_43 = arith.constant dense<0.000000e+00> : vector<64x128xf32>
    %112 = tpu.matmul %111, %79, %cst_43 {dimension_numbers = #tpu.dot_dimension_numbers<[1], [0], [0], [1], [0, 0, 1, 1], [], []>} : vector<64x128xf32>, vector<128x128xf32>, vector<64x128xf32> -> vector<64x128xf32>
    %113 = vector.extract_strided_slice %75 {offsets = [3, 0], sizes = [1, 128], strides = [1, 1]} : vector<8x128xf32> to vector<1x128xf32>
    %114 = vector.broadcast %113 : vector<1x128xf32> to vector<64x128xf32>
    %115 = arith.addf %112, %114 : vector<64x128xf32>
    %116 = vector.extract_strided_slice %75 {offsets = [4, 0], sizes = [1, 128], strides = [1, 1]} : vector<8x128xf32> to vector<1x128xf32>
    %117 = vector.extract_strided_slice %75 {offsets = [5, 0], sizes = [1, 128], strides = [1, 1]} : vector<8x128xf32> to vector<1x128xf32>
    %cst_44 = arith.constant dense<0.000000e+00> : vector<128xf32>
    %118 = vector.multi_reduction <add>, %115, %cst_44 [0] : vector<64x128xf32> to vector<128xf32>
    %119 = vector.shape_cast %118 : vector<128xf32> to vector<1x128xf32>
    %120 = arith.mulf %115, %115 : vector<64x128xf32>
    %cst_45 = arith.constant dense<0.000000e+00> : vector<128xf32>
    %121 = vector.multi_reduction <add>, %120, %cst_45 [0] : vector<64x128xf32> to vector<128xf32>
    %122 = vector.shape_cast %121 : vector<128xf32> to vector<1x128xf32>
    %cst_46 = arith.constant 1.562500e-02 : f32
    %123 = vector.broadcast %cst_46 : f32 to vector<1x128xf32>
    %124 = arith.mulf %119, %123 : vector<1x128xf32>
    %cst_47 = arith.constant 1.562500e-02 : f32
    %125 = vector.broadcast %cst_47 : f32 to vector<1x128xf32>
    %126 = arith.mulf %122, %125 : vector<1x128xf32>
    %127 = arith.mulf %124, %124 : vector<1x128xf32>
    %128 = arith.subf %126, %127 : vector<1x128xf32>
    %cst_48 = arith.constant 0.000000e+00 : f32
    %129 = vector.broadcast %cst_48 : f32 to vector<1x128xf32>
    %130 = arith.maximumf %128, %129 : vector<1x128xf32>
    %131 = vector.broadcast %124 : vector<1x128xf32> to vector<64x128xf32>
    %132 = arith.subf %115, %131 : vector<64x128xf32>
    %cst_49 = arith.constant 9.99999974E-6 : f32
    %133 = vector.broadcast %cst_49 : f32 to vector<1x128xf32>
    %134 = arith.addf %130, %133 : vector<1x128xf32>
    %135 = math.rsqrt %134 : vector<1x128xf32>
    %136 = vector.broadcast %135 : vector<1x128xf32> to vector<64x128xf32>
    %137 = arith.mulf %132, %136 : vector<64x128xf32>
    %138 = vector.broadcast %116 : vector<1x128xf32> to vector<64x128xf32>
    %139 = arith.mulf %137, %138 : vector<64x128xf32>
    %140 = vector.broadcast %117 : vector<1x128xf32> to vector<64x128xf32>
    %141 = arith.addf %139, %140 : vector<64x128xf32>
    %cst_50 = arith.constant 0.000000e+00 : f32
    %142 = vector.broadcast %cst_50 : f32 to vector<64x128xf32>
    %143 = arith.maximumf %141, %142 : vector<64x128xf32>
    %c0_51 = arith.constant 0 : index
    %c0_52 = arith.constant 0 : index
    %144 = vector.load %arg5[%c0_51, %c0_52] : memref<64x128xf32, #tpu.memory_space<vmem>>, vector<64x128xf32>
    tpu.vector_store %arg5[%c0_51, %c0_52], %143 {strides = array<i32>} : memref<64x128xf32, #tpu.memory_space<vmem>>, vector<64x128xf32>,
    %c0_53 = arith.constant 0 : index
    %c0_54 = arith.constant 0 : index
    %145 = vector.load %arg2[%c0_53, %c0_54] : memref<8x64xf32, #tpu.memory_space<vmem>>, vector<8x64xf32>
    %cst_55 = arith.constant dense<0.000000e+00> : vector<8x128xf32>
    %146 = tpu.matmul %145, %143, %cst_55 {dimension_numbers = #tpu.dot_dimension_numbers<[1], [0], [0], [1], [0, 0, 1, 1], [], []>} : vector<8x64xf32>, vector<64x128xf32>, vector<8x128xf32> -> vector<8x128xf32>
    %c0_56 = arith.constant 0 : index
    %c0_57 = arith.constant 0 : index
    %147 = vector.load %arg6[%c0_56, %c0_57] : memref<8x128xf32, #tpu.memory_space<vmem>>, vector<8x128xf32>
    tpu.vector_store %arg6[%c0_56, %c0_57], %146 {strides = array<i32>} : memref<8x128xf32, #tpu.memory_space<vmem>>, vector<8x128xf32>,
    return
  }
}

</mosaic_0001>

<bundles_post_ra>
// kernel: tpu_custom_call.1
= control target key start
LH: loop header
LB: loop body
LE: loop exit
PB: predicated region body
PF: predicated region fallthrough
CT: control target
= control target key end

     0   :  { %12 = vsyncpa [#allocation3], 0  ;;  %s2418_s0 = inlined_call_operand.hbm [shape: f32[64,64], index: 0, kind: input, shape index: {}]   ;;  %s2419_s1 = inlined_call_operand.hbm [shape: f32[64,128], index: 1, kind: input, shape index: {}]   ;;  %s2420_s2 = inlined_call_operand.hbm [shape: f32[8,64], index: 2, kind: input, shape index: {}]   ;;  %s2421_s3 = inlined_call_operand.hbm [shape: f32[4,128,128], index: 3, kind: input, shape index: {}]   ;;  %s2422_s4 = inlined_call_operand.hbm [shape: f32[2,8,128], index: 4, kind: input, shape index: {}]   ;;  %s2423_s5 = inlined_call_operand.hbm [shape: f32[64,128], index: 5, kind: output, shape index: {0}]   ;;  %s2424_s6 = inlined_call_operand.hbm [shape: f32[8,128], index: 6, kind: output, shape index: {1}]  }
   0x1   :  { %13 = vsyncpa [#allocation6], 0 }
   0x2   :  { %14 = vsyncpa [#allocation9], 0 }
   0x3   :  { %15 = vsyncpa [#allocation4], 0 }
   0x4   :  { %16 = vsyncpa [#allocation13], 0  ;;  %s2080_s21 = smov [#allocation5]   ;;  %s2081_s23 = smov [#allocation8]  }
   0x5   :  { %s34_s22 = sshll.u32 %s2080_s21, 4  ;;  %s56_s24 = sshll.u32 %s2081_s23, 4  ;;  %s35_s22 = int_to_ptr.vmem [resolvable:$true] %s34_s22  ;;  %s2127_s24 = int_to_ptr.vmem [resolvable:$true] %s56_s24 }
   0x6   :  { %s1916_s27 = scalar_lea.hbm %s2419_s1, 1024 }
   0x7   :  { %p1917_p0 = scmp.ne.s32.totalorder %s2419_s1, %s1916_s27  ;;  %p1920_p1 = scmp.lt.u32.totalorder %s1916_s27, %s2419_s1 }
   0x9   :  { %p1922_p2 = pnand %p1920_p1, %p1917_p0 }
   0xb   :  { %1925 = shalt.err (!%p1922_p2)
}
   0xc   :  { %s1926_s8 = scalar_lea.vmem %s35_s22, 1024  ;;  %p1931_p4 = scmp.lt.s32.totalorder %s35_s22, %s35_s22 }
   0xd   :  { %p1927_p3 = scmp.ne.s32.totalorder %s35_s22, %s1926_s8  ;;  %p1932_p5 = scmp.lt.s32.totalorder %s1926_s8, %s1926_s8 }
   0xf   :  { %p1933_p6 = por %p1932_p5, %p1931_p4 }
  0x11   :  { %p1934_p7 = pnand %p1933_p6, %p1927_p3 }
  0x13   :  { %1937 = shalt.err (!%p1934_p7)
}
  0x14   :  { %s2082_s9 = smov 128   ;;  %s2083_s10 = smov 8  }
  0x15   :  { %40 = dma.hbm_to_vmem [thread:$0]  %s2419_s1, 1024, %s35_s22, [#allocation6], %s2082_s9, %s2082_s9, %s2083_s10  }
  0x16   :  { %s1938_s15 = scalar_lea.hbm %s2421_s3, 8192 }
  0x17   :  { %p1939_p8 = scmp.ne.s32.totalorder %s2421_s3, %s1938_s15  ;;  %p1942_p9 = scmp.lt.u32.totalorder %s1938_s15, %s2421_s3 }
  0x19   :  { %p1944_p10 = pnand %p1942_p9, %p1939_p8 }
  0x1b   :  { %1947 = shalt.err (!%p1944_p10)
}
  0x1c   :  { %s1948_s20 = scalar_lea.vmem %s2127_s24, 8192  ;;  %p1953_p12 = scmp.lt.s32.totalorder %s2127_s24, %s2127_s24 }
  0x1d   :  { %p1949_p11 = scmp.ne.s32.totalorder %s2127_s24, %s1948_s20  ;;  %p1954_p13 = scmp.lt.s32.totalorder %s1948_s20, %s1948_s20 }
  0x1f   :  { %p1955_p0 = por %p1954_p13, %p1953_p12 }
  0x21   :  { %p1956_p1 = pnand %p1955_p0, %p1949_p11 }
  0x23   :  { %1959 = shalt.err (!%p1956_p1)
}
  0x24   :  { %62 = dma.hbm_to_vmem [thread:$0]  %s2421_s3, 8192, %s2127_s24, [#allocation9], %s2082_s9, %s2082_s9, %s2083_s10  }
  0x25   :  { %s2084_s22 = smov [#allocation2]   ;;  %s2085_s25 = smov [#allocation7]  }
  0x26   :  { %s22_s23 = sshll.u32 %s2084_s22, 4  ;;  %s47_s26 = sshll.u32 %s2085_s25, 4  ;;  %s23_s23 = int_to_ptr.vmem [resolvable:$true] %s22_s23  ;;  %s48_s26 = int_to_ptr.vmem [resolvable:$true] %s47_s26 }
  0x27   :  { %s1960_s29 = scalar_lea.hbm %s2418_s0, 1024 }
  0x28   :  { %p1961_p2 = scmp.ne.s32.totalorder %s2418_s0, %s1960_s29  ;;  %p1964_p3 = scmp.lt.u32.totalorder %s1960_s29, %s2418_s0 }
  0x2a   :  { %p1966_p4 = pnand %p1964_p3, %p1961_p2 }
  0x2c   :  { %1969 = shalt.err (!%p1966_p4)
}
  0x2d   :  { %s1970_s3 = scalar_lea.vmem %s23_s23, 1024  ;;  %p1975_p6 = scmp.lt.s32.totalorder %s23_s23, %s23_s23 }
  0x2e   :  { %p1971_p5 = scmp.ne.s32.totalorder %s23_s23, %s1970_s3  ;;  %p1976_p7 = scmp.lt.s32.totalorder %s1970_s3, %s1970_s3 }
  0x30   :  { %p1977_p8 = por %p1976_p7, %p1975_p6 }
  0x32   :  { %p1978_p9 = pnand %p1977_p8, %p1971_p5 }
  0x34   :  { %1981 = shalt.err (!%p1978_p9)
}
  0x35   :  { %28 = dma.hbm_to_vmem [thread:$0]  %s2418_s0, 1024, %s23_s23, [#allocation3], %s2082_s9, %s2082_s9, %s2083_s10  }
  0x36   :  { %s1982_s15 = scalar_lea.hbm %s2420_s2, 128 }
  0x37   :  { %p1983_p10 = scmp.ne.s32.totalorder %s2420_s2, %s1982_s15  ;;  %p1986_p11 = scmp.lt.u32.totalorder %s1982_s15, %s2420_s2 }
  0x39   :  { %p1988_p12 = pnand %p1986_p11, %p1983_p10 }
  0x3b   :  { %1991 = shalt.err (!%p1988_p12)
}
  0x3c   :  { %s1992_s20 = scalar_lea.vmem %s48_s26, 128  ;;  %p1997_p0 = scmp.lt.s32.totalorder %s48_s26, %s48_s26 }
  0x3d   :  { %p1993_p13 = scmp.ne.s32.totalorder %s48_s26, %s1992_s20  ;;  %p1998_p1 = scmp.lt.s32.totalorder %s1992_s20, %s1992_s20 }
  0x3f   :  { %p1999_p2 = por %p1998_p1, %p1997_p0 }
  0x41   :  { %p2000_p3 = pnand %p1999_p2, %p1993_p13 }
  0x43   :  { %2003 = shalt.err (!%p2000_p3)
}
  0x44   :  { %50 = dma.hbm_to_vmem [thread:$0]  %s2420_s2, 128, %s48_s26, [#allocation6]  }
  0x45   :  { %s2086_s21 = smov [#allocation10]   ;;  %s2004_s27 = scalar_lea.hbm %s2422_s4, 256 }
  0x46   :  { %s68_s22 = sshll.u32 %s2086_s21, 4  ;;  %p2005_p4 = scmp.ne.s32.totalorder %s2422_s4, %s2004_s27  ;;  %s69_s22 = int_to_ptr.vmem [resolvable:$true] %s68_s22 }
  0x47   :  { %p2008_p5 = scmp.lt.u32.totalorder %s2004_s27, %s2422_s4 }
  0x49   :  { %p2010_p6 = pnand %p2008_p5, %p2005_p4 }
  0x4b   :  { %2013 = shalt.err (!%p2010_p6)
}
  0x4c   :  { %s2014_s8 = scalar_lea.vmem %s69_s22, 256  ;;  %p2019_p8 = scmp.lt.s32.totalorder %s69_s22, %s69_s22 }
  0x4d   :  { %p2015_p7 = scmp.ne.s32.totalorder %s69_s22, %s2014_s8  ;;  %p2020_p9 = scmp.lt.s32.totalorder %s2014_s8, %s2014_s8 }
  0x4f   :  { %p2021_p10 = por %p2020_p9, %p2019_p8 }
  0x51   :  { %p2022_p11 = pnand %p2021_p10, %p2015_p7 }
  0x53   :  { %2025 = shalt.err (!%p2022_p11)
}
  0x54   :  { %74 = dma.hbm_to_vmem [thread:$0]  %s2422_s4, 256, %s69_s22, [#allocation9], %s2082_s9, %s2082_s9, %s2083_s10  }
  0x55   :  { %2070 = dma.done.wait [#allocation3], 1024  }
  0x56   :  { %2071 = vsyncadd [#allocation3], 4294966272 }
  0x57   :  { %2072 = dma.done.wait [#allocation6], 1152  }
  0x58   :  { %2073 = vsyncadd [#allocation6], 4294966144 }
  0x59   :  { %2074 = dma.done.wait [#allocation9], 8448  }
  0x5a   :  { %2075 = vsyncadd [#allocation9], 4294958848  ;;  %v98_v0 = vld [vmem:[#allocation5] sm:$0xff]  ;;  %v99_v1 = vld [vmem:[#allocation5 + $0x8] sm:$0xff]  ;;  %vm106_vm0 = vcmask 523264   ;;  %vm2088_vm1 = vmmov 0  }
  0x5b   :  { %v100_v2 = vld [vmem:[#allocation5 + $0x10] sm:$0xff]  ;;  %v1724_v3 = vpack.c.bf16 %v99_v1, %v98_v0  ;;  %v101_v4 = vld [vmem:[#allocation5 + $0x18] sm:$0xff]  ;;  %v102_v6 = vld [vmem:[#allocation5 + $0x20] sm:$0xff]  ;;  %s2090_s4 = smov [#allocation11]  }
  0x5c   :  { %v1728_v5 = vpack.c.bf16 %v101_v4, %v100_v2  ;;  %v103_v7 = vld [vmem:[#allocation5 + $0x28] sm:$0xff]  ;;  %v2206_v8 = vld [vmem:[#allocation2] sm:$0xff]  ;;  %v104_v10 = vld [vmem:[#allocation5 + $0x30] sm:$0xff]  ;;  %s1291_s11 = sshll.u32 %s2090_s4, 4  ;;  %s1292_s11 = int_to_ptr.vmem [resolvable:$true] %s1291_s11 }
  0x5d   :  { %1725 = vmatprep.subr.bf16.mxu0 %v1724_v3  ;;  %1489 = vmatprep.mubr.msk.f32.mxu0 %vm106_vm0, %v2206_v8  ;;  %v1732_v9 = vpack.c.bf16 %v103_v7, %v102_v6  ;;  %v237_v11 = vld [vmem:[#allocation8] sm:$0xff]  ;;  %v238_v12 = vld [vmem:[#allocation8 + $0x8] sm:$0xff]  ;;  %v105_v13 = vld [vmem:[#allocation5 + $0x38] sm:$0xff]  ;;  %s2026_s3 = scalar_lea.vmem %s1292_s11, 1024  ;;  %p2031_p13 = scmp.lt.s32.totalorder %s1292_s11, %s1292_s11 }
  0x5e   :  { %1727 = vmatpush3.bf16.msra.mxu0 %v1724_v3  ;;  %v1740_v14 = vpack.c.bf16 %v238_v12, %v237_v11  ;;  %v239_v15 = vld [vmem:[#allocation8 + $0x10] sm:$0xff]  ;;  %v240_v16 = vld [vmem:[#allocation8 + $0x18] sm:$0xff]  ;;  %v241_v18 = vld [vmem:[#allocation8 + $0x20] sm:$0xff]  ;;  %v1736_v20 = vpack.c.bf16 %v105_v13, %v104_v10  ;;  %v270_v12 = vlaneseq  ;;  %p2027_p12 = scmp.ne.s32.totalorder %s1292_s11, %s2026_s3  ;;  %p2032_p0 = scmp.lt.s32.totalorder %s2026_s3, %s2026_s3 }
  0x5f   :  { %1729 = vmatprep.subr.bf16.mxu0 %v1728_v5  ;;  %v1744_v17 = vpack.c.bf16 %v240_v16, %v239_v15  ;;  %v242_v19 = vld [vmem:[#allocation8 + $0x28] sm:$0xff]  ;;  %v243_v22 = vld [vmem:[#allocation8 + $0x30] sm:$0xff]  ;;  %v244_v23 = vld [vmem:[#allocation8 + $0x38] sm:$0xff] }
  0x60   :  { %1741 = vmatprep.subr.bf16.mxu1 %v1740_v14  ;;  %v1748_v21 = vpack.c.bf16 %v242_v19, %v241_v18  ;;  %v1752_v24 = vpack.c.bf16 %v244_v23, %v243_v22  ;;  %v245_v25 = vld [vmem:[#allocation8 + $0x40] sm:$0xff]  ;;  %v246_v26 = vld [vmem:[#allocation8 + $0x48] sm:$0xff]  ;;  %v247_v30 = vld [vmem:[#allocation8 + $0x50] sm:$0xff]  ;;  %v2240_v13 = vshrl.u32 %v270_v12, 7  ;;  %p2033_p1 = por %p2032_p0, %p2031_p13 }
  0x61   :  { %1743 = vmatpush3.bf16.msra.mxu1 %v1740_v14  ;;  %v2210_v27 = vld [vmem:[#allocation2 + $0x8] sm:$0xff]  ;;  %v2212_v28 = vld [vmem:[#allocation2 + $0x10] sm:$0xff]  ;;  %v1756_v29 = vpack.c.bf16 %v246_v26, %v245_v25  ;;  %v248_v31 = vld [vmem:[#allocation8 + $0x58] sm:$0xff] }
  0x62   :  { %1731 = vmatpush3.bf16.msra.mxu0 %v1728_v5  ;;  %1745 = vmatprep.subr.bf16.mxu1 %v1744_v17  ;;  %v2218_v32 = vld [vmem:[#allocation2 + $0x18] sm:$0xff]  ;;  %v2220_v33 = vld [vmem:[#allocation2 + $0x20] sm:$0xff]  ;;  %v1760_v34 = vpack.c.bf16 %v248_v31, %v247_v30  ;;  %v249_v35 = vld [vmem:[#allocation8 + $0x60] sm:$0xff]  ;;  %v272_v14 = vsub.s32 0, %v2240_v13  ;;  %p2034_p2 = pnand %p2033_p1, %p2027_p12 }
  0x63   :  { %1733 = vmatprep.subr.bf16.mxu0 %v1732_v9  ;;  %v250_v36 = vld [vmem:[#allocation8 + $0x68] sm:$0xff]  ;;  %v2226_v37 = vld [vmem:[#allocation2 + $0x28] sm:$0xff]  ;;  %v251_v40 = vld [vmem:[#allocation8 + $0x70] sm:$0xff] }
  0x64   :  { %v2228_v38 = vld [vmem:[#allocation2 + $0x30] sm:$0xff]  ;;  %v1764_v39 = vpack.c.bf16 %v250_v36, %v249_v35  ;;  %v252_v41 = vld [vmem:[#allocation8 + $0x78] sm:$0xff]  ;;  %v2234_v42 = vld [vmem:[#allocation2 + $0x38] sm:$0xff] }
  0x65   :  { %1747 = vmatpush3.bf16.msra.mxu1 %v1744_v17  ;;  %v1768_v43 = vpack.c.bf16 %v252_v41, %v251_v40  ;;  %v254_v52 = vld [vmem:[#allocation8 + $0x80] sm:$0xff]  ;;  %v255_v53 = vld [vmem:[#allocation8 + $0x88] sm:$0xff]  ;;  %v256_v55 = vld [vmem:[#allocation8 + $0x90] sm:$0xff] }
  0x66   :  { %1735 = vmatpush3.bf16.msra.mxu0 %v1732_v9  ;;  %1749 = vmatprep.subr.bf16.mxu1 %v1748_v21  ;;  %v1772_v54 = vpack.c.bf16 %v255_v53, %v254_v52  ;;  %v257_v56 = vld [vmem:[#allocation8 + $0x98] sm:$0xff]  ;;  %v258_v58 = vld [vmem:[#allocation8 + $0xa0] sm:$0xff]  ;;  %v259_v59 = vld [vmem:[#allocation8 + $0xa8] sm:$0xff] }
  0x67   :  { %1737 = vmatprep.subr.bf16.mxu0 %v1736_v20  ;;  %v1776_v57 = vpack.c.bf16 %v257_v56, %v256_v55  ;;  %v1780_v60 = vpack.c.bf16 %v259_v59, %v258_v58  ;;  %v260_v61 = vld [vmem:[#allocation8 + $0xb0] sm:$0xff]  ;;  %v261_v62 = vld [vmem:[#allocation8 + $0xb8] sm:$0xff]  ;;  %v262_v0 = vld [vmem:[#allocation8 + $0xc0] sm:$0xff] }
  0x68   :  { %v1784_v63 = vpack.c.bf16 %v261_v62, %v260_v61  ;;  %v263_v1 = vld [vmem:[#allocation8 + $0xc8] sm:$0xff]  ;;  %v264_v3 = vld [vmem:[#allocation8 + $0xd0] sm:$0xff]  ;;  %v265_v4 = vld [vmem:[#allocation8 + $0xd8] sm:$0xff] }
  0x69   :  { %1751 = vmatpush3.bf16.msra.mxu1 %v1748_v21  ;;  %v1788_v2 = vpack.c.bf16 %v263_v1, %v262_v0  ;;  %v1792_v5 = vpack.c.bf16 %v265_v4, %v264_v3  ;;  %v266_v6 = vld [vmem:[#allocation8 + $0xe0] sm:$0xff]  ;;  %v267_v7 = vld [vmem:[#allocation8 + $0xe8] sm:$0xff]  ;;  %v268_v9 = vld [vmem:[#allocation8 + $0xf0] sm:$0xff] }
  0x6a   :  { %1739 = vmatpush3.bf16.msra.mxu0 %v1736_v20  ;;  %1753 = vmatprep.subr.bf16.mxu1 %v1752_v24  ;;  %v269_v10 = vld [vmem:[#allocation8 + $0xf8] sm:$0xff]  ;;  %v2243_v15 = vld [vmem:[#allocation10] sm:$0xff] }
  0x6b   :  { %1773 = vmatprep.subr.bf16.mxu0 %v1772_v54  ;;  %v1800_v11 = vpack.c.bf16 %v269_v10, %v268_v9  ;;  %v273_v16 = vrot.slane %v2243_v15, %v272_v14 }
  0x6d   :  { %1490 = vmatmul.mubr.msk.f32.vlgmr.msra.gmra.mrb[0].mxu0 %vm106_vm0, %v2210_v27  ;;  %1755 = vmatpush3.bf16.msra.mxu1 %v1752_v24 }
  0x6e   :  { %1492 = vmatprep.mubr.msk.f32.mxu0 %vm106_vm0, %v2212_v28  ;;  %1757 = vmatprep.subr.bf16.mxu1 %v1756_v29 }
  0x6f   :  { %1775 = vmatpush3.bf16.msra.mxu0 %v1772_v54 }
  0x70   :  { %1777 = vmatprep.subr.bf16.mxu0 %v1776_v57 }
  0x71   :  { %1493 = vmatmul.mubr.msk.f32.gmra.mrb[2].mxu0 %vm106_vm0, %v2218_v32  ;;  %1759 = vmatpush3.bf16.msra.mxu1 %v1756_v29 }
  0x72   :  { %1495 = vmatprep.mubr.msk.f32.mxu0 %vm106_vm0, %v2220_v33  ;;  %1761 = vmatprep.subr.bf16.mxu1 %v1760_v34 }
  0x73   :  { %1779 = vmatpush3.bf16.msra.mxu0 %v1776_v57 }
  0x74   :  { %1781 = vmatprep.subr.bf16.mxu0 %v1780_v60 }
  0x75   :  { %1496 = vmatmul.mubr.msk.f32.gmra.mrb[4].mxu0 %vm106_vm0, %v2226_v37  ;;  %1763 = vmatpush3.bf16.msra.mxu1 %v1760_v34 }
  0x76   :  { %1498 = vmatprep.mubr.msk.f32.mxu0 %vm106_vm0, %v2228_v38  ;;  %1765 = vmatprep.subr.bf16.mxu1 %v1764_v39 }
  0x77   :  { %1783 = vmatpush3.bf16.msra.mxu0 %v1780_v60 }
  0x78   :  { %1785 = vmatprep.subr.bf16.mxu0 %v1784_v63 }
  0x79   :  { %1499 = vmatmul.mubr.msk.f32.gmra.mrb[6].mxu0 %vm106_vm0, %v2234_v42  ;;  %1767 = vmatpush3.bf16.msra.mxu1 %v1764_v39 }
  0x7a   :  { %1769 = vmatprep.subr.bf16.mxu1 %v1768_v43 }
  0x7b   :  { %1787 = vmatpush3.bf16.msra.mxu0 %v1784_v63 }
  0x7c   :  { %1789 = vmatprep.subr.bf16.mxu0 %v1788_v2 }
  0x7d   :  { %1771 = vmatpush3.bf16.msra.mxu1 %v1768_v43 }
  0x7f   :  { %1791 = vmatpush3.bf16.msra.mxu0 %v1788_v2 }
  0x80   :  { %1793 = vmatprep.subr.bf16.mxu0 %v1792_v5 }
  0x83   :  { %1795 = vmatpush3.bf16.msra.mxu0 %v1792_v5 }
 0x140   :  { %v1491_v44 = vpop.f32.mrb[0].mxu0 }
 0x141   :  { %v197_v45 = vpop.f32.mrb[1].mxu0 }
 0x142   :  { %1533 = vmatprep.mubr.f32.mxu1 %v197_v45 }
 0x143   :  { %1534 = vmatmul.mubr.f32.vlgmr.msra.gmra.mrb[0].mxu1 %v1491_v44 }
 0x144   :  { %v1494_v46 = vpop.f32.mrb[2].mxu0 }
 0x145   :  { %v207_v47 = vpop.f32.mrb[3].mxu0 }
 0x146   :  { %1536 = vmatprep.mubr.f32.mxu1 %v207_v47 }
 0x147   :  { %1537 = vmatmul.mubr.f32.gmra.mrb[2].mxu1 %v1494_v46 }
 0x148   :  { %v1497_v48 = vpop.f32.mrb[4].mxu0 }
 0x149   :  { %v217_v49 = vpop.f32.mrb[5].mxu0 }
 0x14a   :  { %1539 = vmatprep.mubr.f32.mxu1 %v217_v49 }
 0x14b   :  { %1540 = vmatmul.mubr.f32.gmra.mrb[4].mxu1 %v1497_v48 }
 0x14c   :  { %v1500_v50 = vpop.f32.mrb[6].mxu0 }
 0x14d   :  { %v227_v51 = vpop.f32.mrb[7].mxu0 }
 0x14e   :  { %1542 = vmatprep.mubr.f32.mxu1 %v227_v51 }
 0x14f   :  { %1543 = vmatmul.mubr.f32.gmra.mrb[6].mxu1 %v1500_v50 }
 0x150   :  { %1605 = vmatprep.mubr.msk.f32.mxu1 %vm106_vm0, %v2206_v8  ;;  %v1796_v8 = vpack.c.bf16 %v267_v7, %v266_v6 }
 0x152   :  { %1797 = vmatprep.subr.bf16.mxu0 %v1796_v8 }
 0x153   :  { %1799 = vmatpush3.bf16.msra.mxu0 %v1796_v8 }
 0x154   :  { %1801 = vmatprep.subr.bf16.mxu0 %v1800_v11 }
 0x157   :  { %1803 = vmatpush3.bf16.msra.mxu0 %v1800_v11 }
 0x216   :  { %v1535_v17 = vpop.f32.mrb[0].mxu1 }
 0x217   :  { %v2248_v18 = vadd.f32 %v1535_v17, %v273_v16  ;;  %v340_v19 = vpop.f32.mrb[1].mxu1 }
 0x218   :  { %v2250_v20 = vadd.f32 %v340_v19, %v273_v16 }
 0x219   :  { %v393_v21 = vmul.f32 %v2248_v18, %v2248_v18 }
 0x21a   :  { %v379_v22 = vadd.f32 %v2248_v18, %v2250_v20  ;;  %v392_v23 = vmul.f32 %v2250_v20, %v2250_v20  ;;  %v1538_v24 = vpop.f32.mrb[2].mxu1 }
 0x21b   :  { %v350_v25 = vpop.f32.mrb[3].mxu1  ;;  %v2258_v29 = vadd.f32 %v1538_v24, %v273_v16 }
 0x21c   :  { %v400_v26 = vadd.f32 %v393_v21, %v392_v23  ;;  %v2260_v30 = vadd.f32 %v350_v25, %v273_v16 }
 0x21d   :  { %v395_v40 = vmul.f32 %v2258_v29, %v2258_v29 }
 0x21e   :  { %v380_v31 = vadd.f32 %v379_v22, %v2260_v30  ;;  %v394_v34 = vmul.f32 %v2260_v30, %v2260_v30  ;;  %v1541_v35 = vpop.f32.mrb[4].mxu1 }
 0x21f   :  { %v366_v36 = vadd.f32 %v1541_v35, %v273_v16  ;;  %v360_v39 = vpop.f32.mrb[5].mxu1  ;;  %v438_v35 = vsub.s32 1, %v2240_v13 }
 0x220   :  { %v401_v41 = vadd.f32 %v400_v26, %v394_v34  ;;  %v361_v43 = vadd.f32 %v360_v39, %v273_v16  ;;  %v381_v44 = vadd.f32 %v380_v31, %v2258_v29  ;;  %v450_v39 = vsub.s32 2, %v2240_v13 }
 0x221   :  { %v397_v49 = vmul.f32 %v366_v36, %v366_v36 }
 0x222   :  { %v382_v45 = vadd.f32 %v381_v44, %v361_v43  ;;  %v396_v46 = vmul.f32 %v361_v43, %v361_v43  ;;  %v402_v47 = vadd.f32 %v401_v41, %v395_v40  ;;  %v1544_v48 = vpop.f32.mrb[6].mxu1 }
 0x223   :  { %v370_v50 = vpop.f32.mrb[7].mxu1  ;;  %v376_v52 = vadd.f32 %v1544_v48, %v273_v16 }
 0x224   :  { %v403_v51 = vadd.f32 %v402_v47, %v396_v46  ;;  %v371_v53 = vadd.f32 %v370_v50, %v273_v16  ;;  %v383_v54 = vadd.f32 %v382_v45, %v366_v36 }
 0x225   :  { %v399_v58 = vmul.f32 %v376_v52, %v376_v52 }
 0x226   :  { %v384_v55 = vadd.f32 %v383_v54, %v371_v53  ;;  %v398_v56 = vmul.f32 %v371_v53, %v371_v53  ;;  %v404_v57 = vadd.f32 %v403_v51, %v397_v49 }
 0x228   :  { %v385_v59 = vadd.f32 %v384_v55, %v376_v52  ;;  %v405_v60 = vadd.f32 %v404_v57, %v398_v56 }
 0x22a   :  { %v386_v61 = vrot.slane %v385_v59, 4  ;;  %v406_v62 = vadd.f32 %v405_v60, %v399_v58 }
 0x22c   :  { %v387_v63 = vadd.f32 %v386_v61, %v385_v59  ;;  %v407_v0 = vrot.slane %v406_v62, 4 }
 0x22e   :  { %v388_v1 = vrot.slane %v387_v63, 2  ;;  %v408_v2 = vadd.f32 %v407_v0, %v406_v62 }
 0x230   :  { %v389_v3 = vadd.f32 %v388_v1, %v387_v63  ;;  %v409_v4 = vrot.slane %v408_v2, 2 }
 0x232   :  { %v390_v5 = vrot.slane %v389_v3, 1  ;;  %v410_v6 = vadd.f32 %v409_v4, %v408_v2 }
 0x234   :  { %v391_v7 = vadd.f32 %v390_v5, %v389_v3  ;;  %v411_v8 = vrot.slane %v410_v6, 1 }
 0x236   :  { %v412_v9 = vadd.f32 %v411_v8, %v410_v6  ;;  %v413_v10 = vmul.f32 0.015625, %v391_v7  ;;  %v774_v7 = vld [vmem:[#allocation8 + $0x100] sm:$0xff]  ;;  %v775_v8 = vld [vmem:[#allocation8 + $0x108] sm:$0xff] }
 0x238   :  { %v414_v11 = vmul.f32 0.015625, %v412_v9  ;;  %v415_v12 = vmul.f32 %v413_v10, %v413_v10  ;;  %v424_v16 = vsub.f32 %v371_v53, %v413_v10  ;;  %v418_v17 = vsub.f32 %v2250_v20, %v413_v10  ;;  %v776_v9 = vld [vmem:[#allocation8 + $0x110] sm:$0xff] }
 0x239   :  { %v419_v19 = vsub.f32 %v2248_v18, %v413_v10  ;;  %v420_v21 = vsub.f32 %v2260_v30, %v413_v10  ;;  %v421_v22 = vsub.f32 %v2258_v29, %v413_v10  ;;  %v422_v23 = vsub.f32 %v361_v43, %v413_v10 }
 0x23a   :  { %v416_v24 = vsub.f32 %v414_v11, %v415_v12  ;;  %v423_v25 = vsub.f32 %v366_v36, %v413_v10  ;;  %v425_v26 = vsub.f32 %v376_v52, %v413_v10  ;;  %v439_v20 = vrot.slane %v2243_v15, %v438_v35  ;;  %v777_v11 = vld [vmem:[#allocation8 + $0x118] sm:$0xff] }
 0x23b   :  { %v451_v29 = vrot.slane %v2243_v15, %v450_v39  ;;  %v1820_v10 = vpack.c.bf16 %v775_v8, %v774_v7  ;;  %v1824_v12 = vpack.c.bf16 %v777_v11, %v776_v9 }
 0x23c   :  { %v417_v31 = vmax.f32 %v416_v24, 0.0  ;;  %v782_v24 = vld [vmem:[#allocation8 + $0x140] sm:$0xff] }
 0x23d   :  { %1821 = vmatprep.subr.bf16.mxu0 %v1820_v10 }
 0x23e   :  { %v426_v34 = vadd.f32 1e-05, %v417_v31  ;;  %v784_v31 = vld [vmem:[#allocation8 + $0x150] sm:$0xff] }
 0x240   :  { %1908 = vrsqrt.f32 %v426_v34  ;;  %v785_v34 = vld [vmem:[#allocation8 + $0x158] sm:$0xff] }
 0x24a   :  { %v1909_v18 = vpop.eup %1908 }
 0x24b   :  { %v434_v30 = vmul.f32 %v1909_v18, %v424_v16  ;;  %v428_v40 = vmul.f32 %v1909_v18, %v418_v17  ;;  %v429_v36 = vmul.f32 %v1909_v18, %v419_v19  ;;  %v430_v41 = vmul.f32 %v1909_v18, %v420_v21  ;;  %v778_v16 = vld [vmem:[#allocation8 + $0x120] sm:$0xff]  ;;  %v779_v17 = vld [vmem:[#allocation8 + $0x128] sm:$0xff]  ;;  %v780_v21 = vld [vmem:[#allocation8 + $0x130] sm:$0xff] }
 0x24c   :  { %v431_v43 = vmul.f32 %v1909_v18, %v421_v22  ;;  %v432_v44 = vmul.f32 %v1909_v18, %v422_v23  ;;  %v433_v45 = vmul.f32 %v1909_v18, %v423_v25  ;;  %v435_v46 = vmul.f32 %v1909_v18, %v425_v26  ;;  %v781_v22 = vld [vmem:[#allocation8 + $0x138] sm:$0xff]  ;;  %v783_v25 = vld [vmem:[#allocation8 + $0x148] sm:$0xff]  ;;  %v786_v18 = vld [vmem:[#allocation8 + $0x160] sm:$0xff] }
 0x24d   :  { %v440_v47 = vmul.f32 %v439_v20, %v428_v40  ;;  %v441_v48 = vmul.f32 %v439_v20, %v429_v36  ;;  %v442_v49 = vmul.f32 %v439_v20, %v430_v41  ;;  %v446_v61 = vmul.f32 %v439_v20, %v434_v30  ;;  %v788_v40 = vld [vmem:[#allocation8 + $0x170] sm:$0xff]  ;;  %v789_v36 = vld [vmem:[#allocation8 + $0x178] sm:$0xff] }
 0x24e   :  { %v443_v50 = vmul.f32 %v439_v20, %v431_v43  ;;  %v444_v54 = vmul.f32 %v439_v20, %v432_v44  ;;  %v445_v58 = vmul.f32 %v439_v20, %v433_v45  ;;  %v447_v0 = vmul.f32 %v439_v20, %v435_v46 }
 0x24f   :  { %v452_v51 = vadd.f32 %v451_v29, %v440_v47  ;;  %v453_v52 = vadd.f32 %v451_v29, %v441_v48  ;;  %v454_v53 = vadd.f32 %v451_v29, %v442_v49  ;;  %v458_v2 = vadd.f32 %v451_v29, %v446_v61 }
 0x250   :  { %v455_v57 = vadd.f32 %v451_v29, %v443_v50  ;;  %v456_v60 = vadd.f32 %v451_v29, %v444_v54  ;;  %v457_v63 = vadd.f32 %v451_v29, %v445_v58  ;;  %v459_v4 = vadd.f32 %v451_v29, %v447_v0  ;;  %v787_v29 = vld [vmem:[#allocation8 + $0x168] sm:$0xff] }
 0x251   :  { %v460_v55 = vmax.f32 %v452_v51, 0.0  ;;  %v461_v56 = vmax.f32 %v453_v52, 0.0  ;;  %v462_v59 = vmax.f32 %v454_v53, 0.0  ;;  %v466_v5 = vmax.f32 %v458_v2, 0.0 }
 0x252   :  { %v463_v62 = vmax.f32 %v455_v57, 0.0  ;;  %v464_v1 = vmax.f32 %v456_v60, 0.0  ;;  %v465_v3 = vmax.f32 %v457_v63, 0.0  ;;  %v467_v6 = vmax.f32 %v459_v4, 0.0 }
 0x253   :  { %1577 = vmatprep.mubr.f32.mxu0 %v460_v55  ;;  %v1828_v19 = vpack.c.bf16 %v779_v17, %v778_v16  ;;  %v1832_v23 = vpack.c.bf16 %v781_v22, %v780_v21  ;;  %v1836_v26 = vpack.c.bf16 %v783_v25, %v782_v24  ;;  %v1840_v20 = vpack.c.bf16 %v785_v34, %v784_v31 }
 0x254   :  { %1578 = vmatmul.mubr.f32.vlgmr.msra.gmra.mrb[8].mxu0 %v461_v56  ;;  %v1844_v30 = vpack.c.bf16 %v787_v29, %v786_v18  ;;  %v1848_v41 = vpack.c.bf16 %v789_v36, %v788_v40  ;;  %v470_v43 = vsub.s32 3, %v2240_v13 }
 0x255   :  { %1580 = vmatprep.mubr.f32.mxu0 %v462_v59  ;;  %1823 = vmatpush3.bf16.msra.mxu0 %v1820_v10 }
 0x256   :  { %1825 = vmatprep.subr.bf16.mxu0 %v1824_v12  ;;  %v471_v44 = vrot.slane %v2243_v15, %v470_v43 }
 0x258   :  { %1581 = vmatmul.mubr.f32.gmra.mrb[10].mxu0 %v463_v62 }
 0x259   :  { %1583 = vmatprep.mubr.f32.mxu0 %v464_v1  ;;  %1827 = vmatpush3.bf16.msra.mxu0 %v1824_v12 }
 0x25a   :  { %1829 = vmatprep.subr.bf16.mxu0 %v1828_v19 }
 0x25c   :  { %1584 = vmatmul.mubr.f32.gmra.mrb[12].mxu0 %v465_v3 }
 0x25d   :  { %1586 = vmatprep.mubr.f32.mxu0 %v466_v5  ;;  %1831 = vmatpush3.bf16.msra.mxu0 %v1828_v19 }
 0x25e   :  { %1833 = vmatprep.subr.bf16.mxu0 %v1832_v23 }
 0x260   :  { %1587 = vmatmul.mubr.f32.gmra.mrb[14].mxu0 %v467_v6 }
 0x261   :  { %1835 = vmatpush3.bf16.msra.mxu0 %v1832_v23 }
 0x262   :  { %1837 = vmatprep.subr.bf16.mxu0 %v1836_v26 }
 0x265   :  { %1839 = vmatpush3.bf16.msra.mxu0 %v1836_v26 }
 0x266   :  { %1841 = vmatprep.subr.bf16.mxu0 %v1840_v20 }
 0x269   :  { %1843 = vmatpush3.bf16.msra.mxu0 %v1840_v20 }
 0x26a   :  { %1845 = vmatprep.subr.bf16.mxu0 %v1844_v30 }
 0x26d   :  { %1847 = vmatpush3.bf16.msra.mxu0 %v1844_v30 }
 0x26e   :  { %1849 = vmatprep.subr.bf16.mxu0 %v1848_v41 }
 0x271   :  { %1851 = vmatpush3.bf16.msra.mxu0 %v1848_v41 }
 0x327   :  { %v1579_v45 = vpop.f32.mrb[8].mxu0 }
 0x328   :  { %v2284_v46 = vadd.f32 %v1579_v45, %v471_v44  ;;  %v538_v47 = vpop.f32.mrb[9].mxu0 }
 0x329   :  { %v2286_v48 = vadd.f32 %v538_v47, %v471_v44 }
 0x32a   :  { %v591_v49 = vmul.f32 %v2284_v46, %v2284_v46 }
 0x32b   :  { %v577_v50 = vadd.f32 %v2284_v46, %v2286_v48  ;;  %v590_v51 = vmul.f32 %v2286_v48, %v2286_v48  ;;  %v1582_v52 = vpop.f32.mrb[10].mxu0 }
 0x32c   :  { %v548_v53 = vpop.f32.mrb[11].mxu0  ;;  %v2294_v55 = vadd.f32 %v1582_v52, %v471_v44 }
 0x32d   :  { %v598_v54 = vadd.f32 %v591_v49, %v590_v51  ;;  %v2296_v56 = vadd.f32 %v548_v53, %v471_v44 }
 0x32e   :  { %v593_v62 = vmul.f32 %v2294_v55, %v2294_v55 }
 0x32f   :  { %v578_v57 = vadd.f32 %v577_v50, %v2296_v56  ;;  %v592_v58 = vmul.f32 %v2296_v56, %v2296_v56  ;;  %v1585_v59 = vpop.f32.mrb[12].mxu0 }
 0x330   :  { %v564_v60 = vadd.f32 %v1585_v59, %v471_v44  ;;  %v558_v61 = vpop.f32.mrb[13].mxu0 }
 0x331   :  { %v599_v63 = vadd.f32 %v598_v54, %v592_v58  ;;  %v559_v0 = vadd.f32 %v558_v61, %v471_v44  ;;  %v579_v1 = vadd.f32 %v578_v57, %v2294_v55 }
 0x332   :  { %v595_v6 = vmul.f32 %v564_v60, %v564_v60 }
 0x333   :  { %v580_v2 = vadd.f32 %v579_v1, %v559_v0  ;;  %v594_v3 = vmul.f32 %v559_v0, %v559_v0  ;;  %v600_v4 = vadd.f32 %v599_v63, %v593_v62  ;;  %v1588_v5 = vpop.f32.mrb[14].mxu0  ;;  %v636_v63 = vsub.s32 4, %v2240_v13 }
 0x334   :  { %v568_v7 = vpop.f32.mrb[15].mxu0  ;;  %v574_v9 = vadd.f32 %v1588_v5, %v471_v44  ;;  %v648_v1 = vsub.s32 5, %v2240_v13 }
 0x335   :  { %v601_v8 = vadd.f32 %v600_v4, %v594_v3  ;;  %v569_v10 = vadd.f32 %v568_v7, %v471_v44  ;;  %v581_v11 = vadd.f32 %v580_v2, %v564_v60 }
 0x336   :  { %v597_v19 = vmul.f32 %v574_v9, %v574_v9 }
 0x337   :  { %v582_v12 = vadd.f32 %v581_v11, %v569_v10  ;;  %v596_v16 = vmul.f32 %v569_v10, %v569_v10  ;;  %v602_v17 = vadd.f32 %v601_v8, %v595_v6 }
 0x339   :  { %v583_v21 = vadd.f32 %v582_v12, %v574_v9  ;;  %v603_v22 = vadd.f32 %v602_v17, %v596_v16 }
 0x33b   :  { %v584_v23 = vrot.slane %v583_v21, 4  ;;  %v604_v24 = vadd.f32 %v603_v22, %v597_v19 }
 0x33d   :  { %v585_v25 = vadd.f32 %v584_v23, %v583_v21  ;;  %v605_v26 = vrot.slane %v604_v24, 4 }
 0x33f   :  { %v586_v31 = vrot.slane %v585_v25, 2  ;;  %v606_v34 = vadd.f32 %v605_v26, %v604_v24 }
 0x341   :  { %v587_v20 = vadd.f32 %v586_v31, %v585_v25  ;;  %v607_v18 = vrot.slane %v606_v34, 2 }
 0x343   :  { %v588_v29 = vrot.slane %v587_v20, 1  ;;  %v608_v30 = vadd.f32 %v607_v18, %v606_v34 }
 0x345   :  { %v589_v40 = vadd.f32 %v588_v29, %v587_v20  ;;  %v609_v36 = vrot.slane %v608_v30, 1 }
 0x347   :  { %v610_v41 = vadd.f32 %v609_v36, %v608_v30  ;;  %v611_v44 = vmul.f32 0.015625, %v589_v40 }
 0x349   :  { %v612_v45 = vmul.f32 0.015625, %v610_v41  ;;  %v613_v47 = vmul.f32 %v611_v44, %v611_v44  ;;  %v622_v49 = vsub.f32 %v569_v10, %v611_v44  ;;  %v616_v50 = vsub.f32 %v2286_v48, %v611_v44 }
 0x34a   :  { %v617_v51 = vsub.f32 %v2284_v46, %v611_v44  ;;  %v618_v52 = vsub.f32 %v2296_v56, %v611_v44  ;;  %v619_v53 = vsub.f32 %v2294_v55, %v611_v44  ;;  %v620_v54 = vsub.f32 %v559_v0, %v611_v44 }
 0x34b   :  { %v614_v57 = vsub.f32 %v612_v45, %v613_v47  ;;  %v621_v58 = vsub.f32 %v564_v60, %v611_v44  ;;  %v623_v59 = vsub.f32 %v574_v9, %v611_v44  ;;  %v637_v48 = vrot.slane %v2243_v15, %v636_v63 }
 0x34c   :  { %v649_v55 = vrot.slane %v2243_v15, %v648_v1 }
 0x34d   :  { %v615_v61 = vmax.f32 %v614_v57, 0.0 }
 0x34f   :  { %v624_v62 = vadd.f32 1e-05, %v615_v61 }
 0x351   :  { %1910 = vrsqrt.f32 %v624_v62  ;;  %v797_v62 = vld [vmem:[#allocation8 + $0x1b0] sm:$0xff] }
 0x35b   :  { %v1911_v46 = vpop.eup %1910 }
 0x35c   :  { %v632_v56 = vmul.f32 %v1911_v46, %v622_v49  ;;  %v626_v0 = vmul.f32 %v1911_v46, %v616_v50  ;;  %v627_v60 = vmul.f32 %v1911_v46, %v617_v51  ;;  %v628_v2 = vmul.f32 %v1911_v46, %v618_v52  ;;  %v792_v52 = vld [vmem:[#allocation8 + $0x188] sm:$0xff] }
 0x35d   :  { %v629_v3 = vmul.f32 %v1911_v46, %v619_v53  ;;  %v630_v4 = vmul.f32 %v1911_v46, %v620_v54  ;;  %v631_v5 = vmul.f32 %v1911_v46, %v621_v58  ;;  %v633_v6 = vmul.f32 %v1911_v46, %v623_v59  ;;  %v794_v54 = vld [vmem:[#allocation8 + $0x198] sm:$0xff]  ;;  %v795_v58 = vld [vmem:[#allocation8 + $0x1a0] sm:$0xff]  ;;  %v796_v59 = vld [vmem:[#allocation8 + $0x1a8] sm:$0xff] }
 0x35e   :  { %v638_v7 = vmul.f32 %v637_v48, %v626_v0  ;;  %v639_v8 = vmul.f32 %v637_v48, %v627_v60  ;;  %v640_v9 = vmul.f32 %v637_v48, %v628_v2  ;;  %v644_v10 = vmul.f32 %v637_v48, %v632_v56  ;;  %v800_v56 = vld [vmem:[#allocation8 + $0x1c8] sm:$0xff]  ;;  %v801_v60 = vld [vmem:[#allocation8 + $0x1d0] sm:$0xff]  ;;  %v802_v2 = vld [vmem:[#allocation8 + $0x1d8] sm:$0xff] }
 0x35f   :  { %v641_v11 = vmul.f32 %v637_v48, %v629_v3  ;;  %v642_v12 = vmul.f32 %v637_v48, %v630_v4  ;;  %v643_v16 = vmul.f32 %v637_v48, %v631_v5  ;;  %v645_v17 = vmul.f32 %v637_v48, %v633_v6  ;;  %v798_v48 = vld [vmem:[#allocation8 + $0x1b8] sm:$0xff]  ;;  %v803_v4 = vld [vmem:[#allocation8 + $0x1e0] sm:$0xff]  ;;  %v804_v5 = vld [vmem:[#allocation8 + $0x1e8] sm:$0xff] }
 0x360   :  { %v650_v19 = vadd.f32 %v649_v55, %v638_v7  ;;  %v651_v21 = vadd.f32 %v649_v55, %v639_v8  ;;  %v652_v22 = vadd.f32 %v649_v55, %v640_v9  ;;  %v656_v15 = vadd.f32 %v649_v55, %v644_v10  ;;  %v805_v6 = vld [vmem:[#allocation8 + $0x1f0] sm:$0xff]  ;;  %v806_v8 = vld [vmem:[#allocation8 + $0x1f8] sm:$0xff]  ;;  %v2330_v10 = vld [vmem:[#allocation10 + $0x8] sm:$0xff] }
 0x361   :  { %v653_v23 = vadd.f32 %v649_v55, %v641_v11  ;;  %v654_v24 = vadd.f32 %v649_v55, %v642_v12  ;;  %v655_v25 = vadd.f32 %v649_v55, %v643_v16  ;;  %v657_v26 = vadd.f32 %v649_v55, %v645_v17  ;;  %v799_v55 = vld [vmem:[#allocation8 + $0x1c0] sm:$0xff] }
 0x362   :  { %v658_v31 = vmax.f32 %v650_v19, 0.0  ;;  %v659_v34 = vmax.f32 %v651_v21, 0.0  ;;  %v660_v20 = vmax.f32 %v652_v22, 0.0  ;;  %v664_v18 = vmax.f32 %v656_v15, 0.0 }
 0x363   :  { %v661_v29 = vmax.f32 %v653_v23, 0.0  ;;  %v662_v30 = vmax.f32 %v654_v24, 0.0  ;;  %v663_v40 = vmax.f32 %v655_v25, 0.0  ;;  %v665_v36 = vmax.f32 %v657_v26, 0.0 }
 0x364   :  { %v1804_v41 = vpack.c.bf16 %v659_v34, %v658_v31  ;;  %v1860_v61 = vpack.c.bf16 %v796_v59, %v795_v58  ;;  %v1864_v46 = vpack.c.bf16 %v798_v48, %v797_v62  ;;  %v1868_v0 = vpack.c.bf16 %v800_v56, %v799_v55 }
 0x365   :  { %v1808_v44 = vpack.c.bf16 %v661_v29, %v660_v20  ;;  %v1812_v45 = vpack.c.bf16 %v663_v40, %v662_v30  ;;  %v1816_v47 = vpack.c.bf16 %v665_v36, %v664_v18  ;;  %v1872_v3 = vpack.c.bf16 %v802_v2, %v801_v60 }
 0x366   :  { %1805 = vmatprep.subr.bf16.mxu1 %v1804_v41  ;;  %v1876_v7 = vpack.c.bf16 %v804_v5, %v803_v4  ;;  %v1880_v9 = vpack.c.bf16 %v806_v8, %v805_v6  ;;  %v810_v11 = vrot.slane %v2330_v10, %v272_v14 }
 0x367   :  { %1807 = vmatpush3.bf16.msra.mxu1 %v1804_v41 }
 0x368   :  { %1809 = vmatprep.subr.bf16.mxu1 %v1808_v44 }
 0x36b   :  { %1811 = vmatpush3.bf16.msra.mxu1 %v1808_v44 }
 0x36c   :  { %1813 = vmatprep.subr.bf16.mxu1 %v1812_v45 }
 0x36f   :  { %1815 = vmatpush3.bf16.msra.mxu1 %v1812_v45 }
 0x370   :  { %1817 = vmatprep.subr.bf16.mxu1 %v1816_v47 }
 0x373   :  { %1819 = vmatpush3.bf16.msra.mxu1 %v1816_v47 }
 0x376   :  { %1606 = vmatmul.mubr.msk.f32.vlgmr.msra.gmra.mrb[8].mxu1 %vm106_vm0, %v2210_v27 }
 0x377   :  { %1608 = vmatprep.mubr.msk.f32.mxu1 %vm106_vm0, %v2212_v28 }
 0x37a   :  { %1609 = vmatmul.mubr.msk.f32.gmra.mrb[10].mxu1 %vm106_vm0, %v2218_v32 }
 0x37b   :  { %1611 = vmatprep.mubr.msk.f32.mxu1 %vm106_vm0, %v2220_v33 }
 0x37e   :  { %1612 = vmatmul.mubr.msk.f32.gmra.mrb[12].mxu1 %vm106_vm0, %v2226_v37 }
 0x37f   :  { %1614 = vmatprep.mubr.msk.f32.mxu1 %vm106_vm0, %v2228_v38  ;;  %v791_v38 = vld [vmem:[#allocation8 + $0x180] sm:$0xff] }
 0x380   :  { %v1852_v53 = vpack.c.bf16 %v792_v52, %v791_v38 }
 0x382   :  { %1615 = vmatmul.mubr.msk.f32.gmra.mrb[14].mxu1 %vm106_vm0, %v2234_v42  ;;  %1853 = vmatprep.subr.bf16.mxu1 %v1852_v53  ;;  %v793_v42 = vld [vmem:[#allocation8 + $0x190] sm:$0xff] }
 0x383   :  { %1855 = vmatpush3.bf16.msra.mxu1 %v1852_v53  ;;  %v1856_v57 = vpack.c.bf16 %v794_v54, %v793_v42 }
 0x385   :  { %1857 = vmatprep.subr.bf16.mxu1 %v1856_v57 }
 0x387   :  { %1859 = vmatpush3.bf16.msra.mxu1 %v1856_v57 }
 0x388   :  { %1861 = vmatprep.subr.bf16.mxu1 %v1860_v61 }
 0x38b   :  { %1863 = vmatpush3.bf16.msra.mxu1 %v1860_v61 }
 0x38c   :  { %1865 = vmatprep.subr.bf16.mxu1 %v1864_v46 }
 0x38f   :  { %1867 = vmatpush3.bf16.msra.mxu1 %v1864_v46 }
 0x390   :  { %1869 = vmatprep.subr.bf16.mxu1 %v1868_v0 }
 0x393   :  { %1871 = vmatpush3.bf16.msra.mxu1 %v1868_v0 }
 0x394   :  { %1873 = vmatprep.subr.bf16.mxu1 %v1872_v3 }
 0x397   :  { %1875 = vmatpush3.bf16.msra.mxu1 %v1872_v3 }
 0x398   :  { %1877 = vmatprep.subr.bf16.mxu1 %v1876_v7 }
 0x39b   :  { %1879 = vmatpush3.bf16.msra.mxu1 %v1876_v7 }
 0x39c   :  { %1881 = vmatprep.subr.bf16.mxu1 %v1880_v9 }
 0x39f   :  { %1883 = vmatpush3.bf16.msra.mxu1 %v1880_v9 }
 0x449   :  { %v1607_v49 = vpop.f32.mrb[8].mxu1 }
 0x44a   :  { %v732_v27 = vpop.f32.mrb[9].mxu1 }
 0x44b   :  { %1649 = vmatprep.mubr.f32.mxu0 %v732_v27 }
 0x44c   :  { %1650 = vmatmul.mubr.f32.vlgmr.msra.gmra.mrb[16].mxu0 %v1607_v49 }
 0x44d   :  { %v1610_v28 = vpop.f32.mrb[10].mxu1 }
 0x44e   :  { %v742_v50 = vpop.f32.mrb[11].mxu1 }
 0x44f   :  { %1652 = vmatprep.mubr.f32.mxu0 %v742_v50 }
 0x450   :  { %1653 = vmatmul.mubr.f32.gmra.mrb[18].mxu0 %v1610_v28 }
 0x451   :  { %v1613_v32 = vpop.f32.mrb[12].mxu1 }
 0x452   :  { %v752_v51 = vpop.f32.mrb[13].mxu1 }
 0x453   :  { %1655 = vmatprep.mubr.f32.mxu0 %v752_v51 }
 0x454   :  { %1656 = vmatmul.mubr.f32.gmra.mrb[20].mxu0 %v1613_v32 }
 0x455   :  { %v1616_v33 = vpop.f32.mrb[14].mxu1 }
 0x456   :  { %v762_v37 = vpop.f32.mrb[15].mxu1 }
 0x457   :  { %1658 = vmatprep.mubr.f32.mxu0 %v762_v37 }
 0x458   :  { %1659 = vmatmul.mubr.f32.gmra.mrb[22].mxu0 %v1616_v33 }
 0x51f   :  { %v1651_v12 = vpop.f32.mrb[16].mxu0 }
 0x520   :  { %v2335_v16 = vadd.f32 %v1651_v12, %v810_v11  ;;  %v877_v17 = vpop.f32.mrb[17].mxu0 }
 0x521   :  { %v2337_v19 = vadd.f32 %v877_v17, %v810_v11 }
 0x522   :  { %v930_v21 = vmul.f32 %v2335_v16, %v2335_v16 }
 0x523   :  { %v916_v22 = vadd.f32 %v2335_v16, %v2337_v19  ;;  %v929_v15 = vmul.f32 %v2337_v19, %v2337_v19  ;;  %v1654_v23 = vpop.f32.mrb[18].mxu0 }
 0x524   :  { %v887_v24 = vpop.f32.mrb[19].mxu0  ;;  %v2345_v26 = vadd.f32 %v1654_v23, %v810_v11 }
 0x525   :  { %v937_v25 = vadd.f32 %v930_v21, %v929_v15  ;;  %v888_v14 = vadd.f32 %v887_v24, %v810_v11 }
 0x526   :  { %v932_v30 = vmul.f32 %v2345_v26, %v2345_v26 }
 0x527   :  { %v917_v31 = vadd.f32 %v916_v22, %v888_v14  ;;  %v931_v34 = vmul.f32 %v888_v14, %v888_v14  ;;  %v1657_v20 = vpop.f32.mrb[20].mxu0 }
 0x528   :  { %v903_v18 = vadd.f32 %v1657_v20, %v810_v11  ;;  %v897_v29 = vpop.f32.mrb[21].mxu0 }
 0x529   :  { %v938_v40 = vadd.f32 %v937_v25, %v931_v34  ;;  %v898_v36 = vadd.f32 %v897_v29, %v810_v11  ;;  %v918_v41 = vadd.f32 %v917_v31, %v2345_v26  ;;  %v976_v25 = vrot.slane %v2330_v10, %v438_v35 }
 0x52a   :  { %v934_v27 = vmul.f32 %v903_v18, %v903_v18 }
 0x52b   :  { %v919_v44 = vadd.f32 %v918_v41, %v898_v36  ;;  %v933_v45 = vmul.f32 %v898_v36, %v898_v36  ;;  %v939_v47 = vadd.f32 %v938_v40, %v932_v30  ;;  %v1660_v49 = vpop.f32.mrb[22].mxu0 }
 0x52c   :  { %v907_v28 = vpop.f32.mrb[23].mxu0  ;;  %v913_v32 = vadd.f32 %v1660_v49, %v810_v11 }
 0x52d   :  { %v940_v50 = vadd.f32 %v939_v47, %v933_v45  ;;  %v908_v51 = vadd.f32 %v907_v28, %v810_v11  ;;  %v920_v33 = vadd.f32 %v919_v44, %v903_v18 }
 0x52e   :  { %v936_v53 = vmul.f32 %v913_v32, %v913_v32 }
 0x52f   :  { %v921_v37 = vadd.f32 %v920_v33, %v908_v51  ;;  %v935_v38 = vmul.f32 %v908_v51, %v908_v51  ;;  %v941_v52 = vadd.f32 %v940_v50, %v934_v27 }
 0x531   :  { %v922_v42 = vadd.f32 %v921_v37, %v913_v32  ;;  %v942_v54 = vadd.f32 %v941_v52, %v935_v38 }
 0x533   :  { %v923_v57 = vrot.slane %v922_v42, 4  ;;  %v943_v58 = vadd.f32 %v942_v54, %v936_v53 }
 0x535   :  { %v924_v59 = vadd.f32 %v923_v57, %v922_v42  ;;  %v944_v61 = vrot.slane %v943_v58, 4 }
 0x537   :  { %v925_v62 = vrot.slane %v924_v59, 2  ;;  %v945_v48 = vadd.f32 %v944_v61, %v943_v58  ;;  %v2087_v61 = vmov 0.0|0.0  }
 0x538   :  { %1884 = vmatprep.subr.bf16.mxu0 %v2087_v61 }
 0x539   :  { %v926_v46 = vadd.f32 %v925_v62, %v924_v59  ;;  %v946_v55 = vrot.slane %v945_v48, 2  ;;  %v2089_v62 = vmov 0.0  }
 0x53a   :  { %1721 = vmatprep.mubr.msk.f32.mxu0 %vm2088_vm1, %v2089_v62 }
 0x53b   :  { %v927_v56 = vrot.slane %v926_v46, 1  ;;  %v947_v0 = vadd.f32 %v946_v55, %v945_v48  ;;  %v1008_v48 = vrot.slane %v2330_v10, %v470_v43 }
 0x53d   :  { %v928_v60 = vadd.f32 %v927_v56, %v926_v46  ;;  %v948_v2 = vrot.slane %v947_v0, 1 }
 0x53f   :  { %v949_v3 = vadd.f32 %v948_v2, %v947_v0  ;;  %v950_v4 = vmul.f32 0.015625, %v928_v60 }
 0x541   :  { %v951_v5 = vmul.f32 0.015625, %v949_v3  ;;  %v952_v6 = vmul.f32 %v950_v4, %v950_v4  ;;  %v961_v7 = vsub.f32 %v908_v51, %v950_v4  ;;  %v955_v8 = vsub.f32 %v2337_v19, %v950_v4 }
 0x542   :  { %v956_v9 = vsub.f32 %v2335_v16, %v950_v4  ;;  %v957_v11 = vsub.f32 %v888_v14, %v950_v4  ;;  %v958_v12 = vsub.f32 %v2345_v26, %v950_v4  ;;  %v959_v17 = vsub.f32 %v898_v36, %v950_v4 }
 0x543   :  { %v953_v21 = vsub.f32 %v951_v5, %v952_v6  ;;  %v960_v22 = vsub.f32 %v903_v18, %v950_v4  ;;  %v962_v15 = vsub.f32 %v913_v32, %v950_v4  ;;  %v988_v19 = vrot.slane %v2330_v10, %v450_v39 }
 0x545   :  { %v954_v23 = vmax.f32 %v953_v21, 0.0 }
 0x547   :  { %v963_v24 = vadd.f32 1e-05, %v954_v23 }
 0x549   :  { %1912 = vrsqrt.f32 %v963_v24 }
 0x553   :  { %v1913_v31 = vpop.eup %1912 }
 0x554   :  { %v971_v16 = vmul.f32 %v1913_v31, %v961_v7  ;;  %v965_v14 = vmul.f32 %v1913_v31, %v955_v8  ;;  %v966_v34 = vmul.f32 %v1913_v31, %v956_v9  ;;  %v967_v26 = vmul.f32 %v1913_v31, %v957_v11 }
 0x555   :  { %v968_v20 = vmul.f32 %v1913_v31, %v958_v12  ;;  %v969_v29 = vmul.f32 %v1913_v31, %v959_v17  ;;  %v970_v18 = vmul.f32 %v1913_v31, %v960_v22  ;;  %v972_v30 = vmul.f32 %v1913_v31, %v962_v15 }
 0x556   :  { %v977_v40 = vmul.f32 %v976_v25, %v965_v14  ;;  %v978_v36 = vmul.f32 %v976_v25, %v966_v34  ;;  %v979_v41 = vmul.f32 %v976_v25, %v967_v26  ;;  %v983_v33 = vmul.f32 %v976_v25, %v971_v16 }
 0x557   :  { %v980_v44 = vmul.f32 %v976_v25, %v968_v20  ;;  %v981_v49 = vmul.f32 %v976_v25, %v969_v29  ;;  %v982_v39 = vmul.f32 %v976_v25, %v970_v18  ;;  %v984_v52 = vmul.f32 %v976_v25, %v972_v30 }
 0x558   :  { %v989_v45 = vadd.f32 %v988_v19, %v977_v40  ;;  %v990_v47 = vadd.f32 %v988_v19, %v978_v36  ;;  %v991_v35 = vadd.f32 %v988_v19, %v979_v41  ;;  %v995_v42 = vadd.f32 %v988_v19, %v983_v33 }
 0x559   :  { %v992_v50 = vadd.f32 %v988_v19, %v980_v44  ;;  %v993_v51 = vadd.f32 %v988_v19, %v981_v49  ;;  %v994_v38 = vadd.f32 %v988_v19, %v982_v39  ;;  %v996_v57 = vadd.f32 %v988_v19, %v984_v52 }
 0x55a   :  { %v997_v27 = vmax.f32 %v989_v45, 0.0  ;;  %v998_v28 = vmax.f32 %v990_v47, 0.0  ;;  %v999_v32 = vmax.f32 %v991_v35, 0.0  ;;  %v1003_v58 = vmax.f32 %v995_v42, 0.0 }
 0x55b   :  { %v1000_v37 = vmax.f32 %v992_v50, 0.0  ;;  %v1001_v53 = vmax.f32 %v993_v51, 0.0  ;;  %v1002_v54 = vmax.f32 %v994_v38, 0.0  ;;  %v1004_v59 = vmax.f32 %v996_v57, 0.0 }
 0x55c   :  { %1693 = vmatprep.mubr.f32.mxu1 %v997_v27 }
 0x55d   :  { %1694 = vmatmul.mubr.f32.vlgmr.msra.gmra.mrb[16].mxu1 %v998_v28 }
 0x55e   :  { %1696 = vmatprep.mubr.f32.mxu1 %v999_v32 }
 0x561   :  { %1697 = vmatmul.mubr.f32.gmra.mrb[18].mxu1 %v1000_v37 }
 0x562   :  { %1699 = vmatprep.mubr.f32.mxu1 %v1001_v53 }
 0x565   :  { %1700 = vmatmul.mubr.f32.gmra.mrb[20].mxu1 %v1002_v54 }
 0x566   :  { %1702 = vmatprep.mubr.f32.mxu1 %v1003_v58 }
 0x569   :  { %1703 = vmatmul.mubr.f32.gmra.mrb[22].mxu1 %v1004_v59 }
 0x630   :  { %v1695_v46 = vpop.f32.mrb[16].mxu1 }
 0x631   :  { %v2363_v55 = vadd.f32 %v1695_v46, %v1008_v48  ;;  %v1075_v56 = vpop.f32.mrb[17].mxu1 }
 0x632   :  { %v2365_v0 = vadd.f32 %v1075_v56, %v1008_v48 }
 0x633   :  { %v1128_v60 = vmul.f32 %v2363_v55, %v2363_v55 }
 0x634   :  { %v1114_v2 = vadd.f32 %v2363_v55, %v2365_v0  ;;  %v1127_v3 = vmul.f32 %v2365_v0, %v2365_v0  ;;  %v1698_v4 = vpop.f32.mrb[18].mxu1 }
 0x635   :  { %v1085_v5 = vpop.f32.mrb[19].mxu1  ;;  %v2373_v7 = vadd.f32 %v1698_v4, %v1008_v48  ;;  %v1174_v4 = vrot.slane %v2330_v10, %v636_v63 }
 0x636   :  { %v1135_v6 = vadd.f32 %v1128_v60, %v1127_v3  ;;  %v1086_v43 = vadd.f32 %v1085_v5, %v1008_v48 }
 0x637   :  { %v1130_v21 = vmul.f32 %v2373_v7, %v2373_v7 }
 0x638   :  { %v1115_v8 = vadd.f32 %v1114_v2, %v1086_v43  ;;  %v1129_v9 = vmul.f32 %v1086_v43, %v1086_v43  ;;  %v1701_v11 = vpop.f32.mrb[20].mxu1 }
 0x639   :  { %v1101_v12 = vadd.f32 %v1701_v11, %v1008_v48  ;;  %v1095_v17 = vpop.f32.mrb[21].mxu1 }
 0x63a   :  { %v1136_v22 = vadd.f32 %v1135_v6, %v1129_v9  ;;  %v1096_v15 = vadd.f32 %v1095_v17, %v1008_v48  ;;  %v1116_v23 = vadd.f32 %v1115_v8, %v2373_v7 }
 0x63b   :  { %v1132_v16 = vmul.f32 %v1101_v12, %v1101_v12 }
 0x63c   :  { %v1117_v24 = vadd.f32 %v1116_v23, %v1096_v15  ;;  %v1131_v25 = vmul.f32 %v1096_v15, %v1096_v15  ;;  %v1137_v31 = vadd.f32 %v1136_v22, %v1130_v21  ;;  %v1704_v19 = vpop.f32.mrb[22].mxu1 }
 0x63d   :  { %v1105_v14 = vpop.f32.mrb[23].mxu1  ;;  %v1111_v26 = vadd.f32 %v1704_v19, %v1008_v48 }
 0x63e   :  { %v1138_v34 = vadd.f32 %v1137_v31, %v1131_v25  ;;  %v1106_v20 = vadd.f32 %v1105_v14, %v1008_v48  ;;  %v1118_v29 = vadd.f32 %v1117_v24, %v1101_v12 }
 0x63f   :  { %v1134_v36 = vmul.f32 %v1111_v26, %v1111_v26 }
 0x640   :  { %v1119_v18 = vadd.f32 %v1118_v29, %v1106_v20  ;;  %v1133_v30 = vmul.f32 %v1106_v20, %v1106_v20  ;;  %v1139_v40 = vadd.f32 %v1138_v34, %v1132_v16 }
 0x642   :  { %v1120_v41 = vadd.f32 %v1119_v18, %v1111_v26  ;;  %v1140_v44 = vadd.f32 %v1139_v40, %v1133_v30 }
 0x644   :  { %v1121_v45 = vrot.slane %v1120_v41, 4  ;;  %v1141_v47 = vadd.f32 %v1140_v44, %v1134_v36 }
 0x646   :  { %v1122_v35 = vadd.f32 %v1121_v45, %v1120_v41  ;;  %v1142_v49 = vrot.slane %v1141_v47, 4 }
 0x648   :  { %v1123_v27 = vrot.slane %v1122_v35, 2  ;;  %v1143_v28 = vadd.f32 %v1142_v49, %v1141_v47  ;;  %v1211_v49 = vld [vmem:[#allocation7] sm:$0xff] }
 0x64a   :  { %v1124_v50 = vadd.f32 %v1123_v27, %v1122_v35  ;;  %v1144_v39 = vrot.slane %v1143_v28, 2 }
 0x64c   :  { %v1125_v32 = vrot.slane %v1124_v50, 1  ;;  %v1145_v51 = vadd.f32 %v1144_v39, %v1143_v28 }
 0x64e   :  { %v1126_v33 = vadd.f32 %v1125_v32, %v1124_v50  ;;  %v1146_v37 = vrot.slane %v1145_v51, 1 }
 0x650   :  { %v1147_v38 = vadd.f32 %v1146_v37, %v1145_v51  ;;  %v1148_v52 = vmul.f32 0.015625, %v1126_v33 }
 0x652   :  { %v1149_v53 = vmul.f32 0.015625, %v1147_v38  ;;  %v1150_v42 = vmul.f32 %v1148_v52, %v1148_v52  ;;  %v1159_v54 = vsub.f32 %v1106_v20, %v1148_v52  ;;  %v1153_v57 = vsub.f32 %v2365_v0, %v1148_v52 }
 0x653   :  { %v1154_v58 = vsub.f32 %v2363_v55, %v1148_v52  ;;  %v1155_v59 = vsub.f32 %v1086_v43, %v1148_v52  ;;  %v1156_v62 = vsub.f32 %v2373_v7, %v1148_v52  ;;  %v1157_v48 = vsub.f32 %v1096_v15, %v1148_v52 }
 0x654   :  { %v1151_v46 = vsub.f32 %v1149_v53, %v1150_v42  ;;  %v1158_v56 = vsub.f32 %v1101_v12, %v1148_v52  ;;  %v1160_v60 = vsub.f32 %v1111_v26, %v1148_v52  ;;  %v1186_v0 = vrot.slane %v2330_v10, %v648_v1 }
 0x656   :  { %v1152_v2 = vmax.f32 %v1151_v46, 0.0 }
 0x658   :  { %v1161_v3 = vadd.f32 1e-05, %v1152_v2 }
 0x65a   :  { %1914 = vrsqrt.f32 %v1161_v3 }
 0x664   :  { %v1915_v5 = vpop.eup %1914 }
 0x665   :  { %v1169_v55 = vmul.f32 %v1915_v5, %v1159_v54  ;;  %v1163_v6 = vmul.f32 %v1915_v5, %v1153_v57  ;;  %v1164_v43 = vmul.f32 %v1915_v5, %v1154_v58  ;;  %v1165_v7 = vmul.f32 %v1915_v5, %v1155_v59 }
 0x666   :  { %v1166_v8 = vmul.f32 %v1915_v5, %v1156_v62  ;;  %v1167_v9 = vmul.f32 %v1915_v5, %v1157_v48  ;;  %v1168_v11 = vmul.f32 %v1915_v5, %v1158_v56  ;;  %v1170_v12 = vmul.f32 %v1915_v5, %v1160_v60 }
 0x667   :  { %v1181_v17 = vmul.f32 %v1174_v4, %v1169_v55  ;;  %v1175_v21 = vmul.f32 %v1174_v4, %v1163_v6  ;;  %v1176_v22 = vmul.f32 %v1174_v4, %v1164_v43  ;;  %v1177_v15 = vmul.f32 %v1174_v4, %v1165_v7 }
 0x668   :  { %v1178_v23 = vmul.f32 %v1174_v4, %v1166_v8  ;;  %v1179_v24 = vmul.f32 %v1174_v4, %v1167_v9  ;;  %v1180_v63 = vmul.f32 %v1174_v4, %v1168_v11  ;;  %v1182_v25 = vmul.f32 %v1174_v4, %v1170_v12 }
 0x669   :  { %v1187_v31 = vadd.f32 %v1186_v0, %v1175_v21  ;;  %v1188_v13 = vadd.f32 %v1186_v0, %v1176_v22  ;;  %v1189_v19 = vadd.f32 %v1186_v0, %v1177_v15  ;;  %v1193_v1 = vadd.f32 %v1186_v0, %v1181_v17 }
 0x66a   :  { %v1190_v10 = vadd.f32 %v1186_v0, %v1178_v23  ;;  %v1191_v16 = vadd.f32 %v1186_v0, %v1179_v24  ;;  %v1192_v14 = vadd.f32 %v1186_v0, %v1180_v63  ;;  %v1194_v34 = vadd.f32 %v1186_v0, %v1182_v25 }
 0x66b   :  { %v1195_v26 = vmax.f32 %v1187_v31, 0.0  ;;  %v1196_v20 = vmax.f32 %v1188_v13, 0.0  ;;  %v1197_v29 = vmax.f32 %v1189_v19, 0.0  ;;  %v1201_v18 = vmax.f32 %v1193_v1, 0.0 }
 0x66c   :  { %v1198_v30 = vmax.f32 %v1190_v10, 0.0  ;;  %v1199_v40 = vmax.f32 %v1191_v16, 0.0  ;;  %v1200_v36 = vmax.f32 %v1192_v14, 0.0  ;;  %v1202_v41 = vmax.f32 %v1194_v34, 0.0 }
 0x66d   :  { %1203 = vst [vmem:[#allocation11] sm:$0xff] %v1195_v26  ;;  %1204 = vst [vmem:[#allocation11 + $0x8] sm:$0xff] %v1196_v20  ;;  %v1885_v44 = vpack.c.bf16 %v1196_v20, %v1195_v26 }
 0x66e   :  { %1205 = vst [vmem:[#allocation11 + $0x10] sm:$0xff] %v1197_v29  ;;  %1209 = vst [vmem:[#allocation11 + $0x30] sm:$0xff] %v1201_v18  ;;  %v1888_v45 = vpack.c.bf16 %v1198_v30, %v1197_v29  ;;  %v1891_v47 = vpack.c.bf16 %v1200_v36, %v1199_v40  ;;  %v1894_v35 = vpack.c.bf16 %v1202_v41, %v1201_v18 }
 0x66f   :  { %1206 = vst [vmem:[#allocation11 + $0x18] sm:$0xff] %v1198_v30  ;;  %1207 = vst [vmem:[#allocation11 + $0x20] sm:$0xff] %v1199_v40  ;;  %1886 = vmatpush3.bf16.msra.mxu0 %v1885_v44 }
 0x670   :  { %1208 = vst [vmem:[#allocation11 + $0x28] sm:$0xff] %v1200_v36  ;;  %1210 = vst [vmem:[#allocation11 + $0x38] sm:$0xff] %v1202_v41  ;;  %1887 = vmatprep.subr.bf16.mxu0 %v2087_v61 }
 0x673   :  { %1889 = vmatpush3.bf16.msra.mxu0 %v1888_v45 }
 0x674   :  { %1890 = vmatprep.subr.bf16.mxu0 %v2087_v61 }
 0x677   :  { %1892 = vmatpush3.bf16.msra.mxu0 %v1891_v47 }
 0x678   :  { %1893 = vmatprep.subr.bf16.mxu0 %v2087_v61 }
 0x67b   :  { %1895 = vmatpush3.bf16.msra.mxu0 %v1894_v35 }
 0x67e   :  { %1722 = vmatmul.mubr.msk.f32.vlgmr.msra.gmra.mrb[24].mxu0 %vm106_vm0, %v1211_v49 }
 0x67f   :  { %2037 = shalt.err (!%p2034_p2)
}
 0x680   :  { %s2038_s13 = scalar_lea.hbm %s2423_s5, 1024 }
 0x681   :  { %p2039_p3 = scmp.ne.s32.totalorder %s2423_s5, %s2038_s13  ;;  %p2042_p4 = scmp.lt.u32.totalorder %s2038_s13, %s2423_s5 }
 0x683   :  { %p2044_p5 = pnand %p2042_p4, %p2039_p3 }
 0x685   :  { %2047 = shalt.err (!%p2044_p5)
}
 0x686   :  { %1297 = dma.vmem_to_hbm [thread:$0]  %s1292_s11, 1024, %s2423_s5, [#allocation4], %s2082_s9, %s2082_s9, %s2083_s10  }
 0x687   :  { %s2091_s20 = smov [#allocation12]  }
 0x688   :  { %s1304_s0 = sshll.u32 %s2091_s20, 4  ;;  %s1305_s0 = int_to_ptr.vmem [resolvable:$true] %s1304_s0 }
 0x689   :  { %s2048_s1 = scalar_lea.vmem %s1305_s0, 128  ;;  %p2053_p7 = scmp.lt.s32.totalorder %s1305_s0, %s1305_s0 }
 0x68a   :  { %p2049_p6 = scmp.ne.s32.totalorder %s1305_s0, %s2048_s1  ;;  %p2054_p8 = scmp.lt.s32.totalorder %s2048_s1, %s2048_s1 }
 0x68c   :  { %p2055_p9 = por %p2054_p8, %p2053_p7 }
 0x68e   :  { %p2056_p10 = pnand %p2055_p9, %p2049_p6 }
 0x751   :  { %v1281_v61 = vpop.f32.mrb[24].mxu0 }
 0x752   :  { %1285 = vst [vmem:[#allocation12] sm:$0xff] %v1281_v61  ;;  %v1723_v27 = vpop.f32.mrb[25].mxu0 }
 0x753   :  { %2059 = shalt.err (!%p2056_p10)
}
 0x754   :  { %s2060_s23 = scalar_lea.hbm %s2424_s6, 128 }
 0x755   :  { %p2061_p11 = scmp.ne.s32.totalorder %s2424_s6, %s2060_s23  ;;  %p2064_p12 = scmp.lt.u32.totalorder %s2060_s23, %s2424_s6 }
 0x757   :  { %p2066_p13 = pnand %p2064_p12, %p2061_p11 }
 0x759   :  { %2069 = shalt.err (!%p2066_p13)
}
 0x75a   :  { %1307 = dma.vmem_to_hbm [thread:$0]  %s1305_s0, 128, %s2424_s6, [#allocation13]  }
 0x75b   :  { %2076 = dma.done.wait [#allocation4], 1024  }
 0x75c   :  { %2077 = vsyncadd [#allocation4], 4294966272 }
 0x75d   :  { %2078 = dma.done.wait [#allocation13], 128  }
 0x75e   :  { %2079 = vsyncadd [#allocation13], 4294967168 }
 0x75f   :  { %1314 = vsyncpa [#allocation3], 1 }
 0x760   :  { %1315 = vsyncpa [#allocation6], 1 }
 0x761   :  { %1316 = vsyncpa [#allocation9], 1 }
 0x762   :  { %1317 = vsyncpa [#allocation4], 1 }
 0x763   :  { %1318 = vsyncpa [#allocation13], 1 }

</bundles_post_ra>
